<compile_context>
chip_gen: v5e
topology: v5e:2x2
jax: 0.10.0
libtpu: 0.0.40
codegen_flags: <defaults>
</compile_context>

<pallas_src>
import functools

import jax
import jax.numpy as jnp
from jax.experimental import pallas as pl
from jax.experimental.pallas import tpu as pltpu


# --------------------------------------------------------------------------
# Pallas kernels
# --------------------------------------------------------------------------

def _conv1d_bn_lrelu_kernel(x_ref, w_ref, scale_ref, bias_ref, o_ref, *,
                            ksize, lout, ngsl):
    """Per-sample fused Conv1d + BatchNorm1d(eval) + LeakyReLU.

    out = LeakyReLU((sum_t W[t] @ x[:, t:t+Lout]) * scale + bias)
    x_ref:  (1, Cin, L)      VMEM
    w_ref:  (ksize, Cout, Cin)
    scale_ref / bias_ref: (Cout, 1)
    o_ref:  (1, Cout, Lout)
    """
    x = x_ref[0]                                    # (Cin, L)
    cout = o_ref.shape[1]
    acc = jnp.zeros((cout, lout), jnp.float32)
    for t in range(ksize):                          # static unroll over taps (small)
        acc = acc + jnp.dot(w_ref[t], x[:, t:t + lout],
                            preferred_element_type=jnp.float32)
    y = acc * scale_ref[...] + bias_ref[...]        # folded BN(eval) + conv bias
    y = jnp.where(y >= 0.0, y, ngsl * y)            # LeakyReLU(negative_slope=ngsl)
    o_ref[0] = y.astype(o_ref.dtype)


def conv1d_bn_lrelu(x, w, scale, bias, *, ngsl):
    """x: (N, Cin, L) f32; w: (Cout, Cin, ksize) (PyTorch Conv1d layout)."""
    N, Cin, L = x.shape
    Cout, _, ksize = w.shape
    Lout = L - ksize + 1
    w_t = jnp.transpose(w, (2, 0, 1))               # (ksize, Cout, Cin) -- tiny plumbing
    scale2 = scale.reshape(Cout, 1)
    bias2 = bias.reshape(Cout, 1)

    return pl.pallas_call(
        functools.partial(_conv1d_bn_lrelu_kernel,
                          ksize=ksize, lout=Lout, ngsl=ngsl),
        out_shape=jax.ShapeDtypeStruct((N, Cout, Lout), jnp.float32),
        grid=(N,),
        in_specs=[
            pl.BlockSpec((1, Cin, L), lambda n: (n, 0, 0)),
            pl.BlockSpec((ksize, Cout, Cin), lambda n: (0, 0, 0)),
            pl.BlockSpec((Cout, 1), lambda n: (0, 0)),
            pl.BlockSpec((Cout, 1), lambda n: (0, 0)),
        ],
        out_specs=pl.BlockSpec((1, Cout, Lout), lambda n: (n, 0, 0)),
        compiler_params=pltpu.CompilerParams(
            dimension_semantics=("parallel",)),
    )(x, w_t, scale2, bias2)


def _linear_kernel(a_ref, w_ref, b_ref, o_ref, *, act):
    """out = act(A @ W + b); act in {None, 'relu', 'log_softmax'} (fused epilogue)."""
    y = jnp.dot(a_ref[...], w_ref[...],
                preferred_element_type=jnp.float32) + b_ref[...]
    if act == "relu":
        y = jnp.maximum(y, 0.0)
    elif act == "log_softmax":
        m = jnp.max(y, axis=-1, keepdims=True)
        y = (y - m) - jnp.log(jnp.sum(jnp.exp(y - m), axis=-1, keepdims=True))
    o_ref[...] = y.astype(o_ref.dtype)


def fused_linear(a, w, b, *, act=None):
    """Single-block fused matmul: full K / full N (weights are << VMEM here)."""
    M, K = a.shape
    K2, N = w.shape
    assert K == K2
    b2 = b.reshape(1, N)
    return pl.pallas_call(
        functools.partial(_linear_kernel, act=act),
        out_shape=jax.ShapeDtypeStruct((M, N), jnp.float32),
        grid=(1,),
        in_specs=[
            pl.BlockSpec((M, K), lambda i: (0, 0)),
            pl.BlockSpec((K, N), lambda i: (0, 0)),
            pl.BlockSpec((1, N), lambda i: (0, 0)),
        ],
        out_specs=pl.BlockSpec((M, N), lambda i: (0, 0)),
        compiler_params=pltpu.CompilerParams(
            dimension_semantics=("arbitrary",)),
    )(a, w, b2)


# --------------------------------------------------------------------------
# Forward pass (mirrors cnn1d_LeakyReLU_notpool.forward, eval mode)
# --------------------------------------------------------------------------

def cnn1d_leakyrelu_notpool_forward(params, x, *, ngsl=0.2, eps=1e-5):
    # x: (N, C, L) -- PyTorch Conv1d layout.
    for p in params["convs"]:
        scale = p["gamma"] / jnp.sqrt(p["var"] + eps)        # BN eval-mode fold
        bias = (p["b"] - p["mean"]) * scale + p["beta"]
        x = conv1d_bn_lrelu(x, p["w"], scale, bias, ngsl=ngsl)

    x = x.reshape(x.shape[0], -1)                            # nn.Flatten(): (N, C*L)
    # nn.Dropout(p=drop): identity in eval/inference mode.
    x = fused_linear(x, params["fc1"]["w"], params["fc1"]["b"], act="relu")
    # nn.Dropout(p=drop): identity in eval/inference mode.
    return fused_linear(x, params["fc2"]["w"], params["fc2"]["b"], act="log_softmax")


# --------------------------------------------------------------------------
# Deterministic synthetic parameters (shapes match the PyTorch module)
# --------------------------------------------------------------------------

def init_params(key, chlist, kslist, classes, linear2in, seq_len):
    n_conv = len(chlist) - 1
    keys = jax.random.split(key, n_conv + 2)

    convs = []
    L = seq_len
    for i in range(n_conv):
        cin, cout, ks = chlist[i], chlist[i + 1], kslist[i]
        k1, k2, k3, k4 = jax.random.split(keys[i], 4)
        fan_in = cin * ks
        convs.append(dict(
            w=jax.random.normal(k1, (cout, cin, ks), jnp.float32)
              / jnp.sqrt(jnp.float32(fan_in)),                  # PyTorch layout
            b=0.05 * jax.random.normal(k2, (cout,), jnp.float32),
            gamma=1.0 + 0.1 * jax.random.normal(k3, (cout,), jnp.float32),
            beta=0.1 * jax.random.normal(k4, (cout,), jnp.float32),
            mean=jnp.zeros((cout,), jnp.float32),               # eval-mode running stats
            var=jnp.ones((cout,), jnp.float32),
        ))
        L = L - ks + 1

    flat_dim = chlist[-1] * L                                   # LazyLinear in_features

    def lin(k, din, dout):
        k1, k2 = jax.random.split(k)
        # stored as (in, out) so the kernel computes x @ W directly
        return dict(w=jax.random.normal(k1, (din, dout), jnp.float32)
                      / jnp.sqrt(jnp.float32(din)),
                    b=0.05 * jax.random.normal(k2, (dout,), jnp.float32))

    return dict(
        convs=convs,
        fc1=lin(keys[n_conv], flat_dim, linear2in),
        fc2=lin(keys[n_conv + 1], linear2in, classes),
    )


if __name__ == "__main__":
    # Small shapes consistent with the module:
    #   chlist=[4,16,32], kslist=[5,3], L=64 -> conv out (N,32,58) -> flatten 1856
    chlist = [4, 16, 32]
    kslist = [5, 3]
    classes = 10
    linear2in = 64
    seq_len = 64
    batch = 2
    ngsl = 0.2       # LeakyReLU negative slope (module default)
    # drop = 0.1     # Dropout prob -- identity in eval mode, so unused here.

    key = jax.random.PRNGKey(0)
    kx, kp = jax.random.split(key)
    x = jax.random.normal(kx, (batch, chlist[0], seq_len), jnp.float32)
    params = init_params(kp, chlist, kslist, classes, linear2in, seq_len)

    fwd = jax.jit(functools.partial(cnn1d_leakyrelu_notpool_forward, ngsl=ngsl))
    out = fwd(params, x)
    jax.block_until_ready(out)

    assert out.shape == (batch, classes)
    assert bool(jnp.all(jnp.isfinite(out)))
    # log_softmax rows must exponentiate-sum to 1
    assert bool(jnp.allclose(jnp.sum(jnp.exp(out), axis=1), 1.0, atol=1e-4))
    print("KERNEL_OK")
</pallas_src>

<mosaic_0001>
module attributes {stable_mosaic.version = 11 : i64} {
  func.func @_conv1d_bn_lrelu_kernel(%arg0: i32, %arg1: memref<1x4x64xf32, #tpu.memory_space<vmem>>, %arg2: memref<5x16x4xf32, #tpu.memory_space<vmem>>, %arg3: memref<16x1xf32, #tpu.memory_space<vmem>>, %arg4: memref<16x1xf32, #tpu.memory_space<vmem>>, %arg5: memref<1x16x60xf32, #tpu.memory_space<vmem>>) attributes {dimension_semantics = [#tpu.dimension_semantics<parallel>], iteration_bounds = array<i64: 2>, scalar_prefetch = 0 : i64, scratch_operands = 0 : i64, tpu.core_type = #tpu.core_type<tc>, window_params = [{transform_indices = @transform_0, window_bounds = array<i64: 1, 4, 64>}, {pipeline_mode = #tpu.pipeline_mode<synchronous>, transform_indices = @transform_1, window_bounds = array<i64: 5, 16, 4>}, {pipeline_mode = #tpu.pipeline_mode<synchronous>, transform_indices = @transform_2, window_bounds = array<i64: 16, 1>}, {pipeline_mode = #tpu.pipeline_mode<synchronous>, transform_indices = @transform_3, window_bounds = array<i64: 16, 1>}, {transform_indices = @transform_4, window_bounds = array<i64: 1, 16, 60>}]} {
    %c0 = arith.constant 0 : index
    %c0_0 = arith.constant 0 : index
    %c0_1 = arith.constant 0 : index
    %0 = vector.load %arg1[%c0, %c0_0, %c0_1] : memref<1x4x64xf32, #tpu.memory_space<vmem>>, vector<1x4x64xf32>
    %1 = vector.shape_cast %0 : vector<1x4x64xf32> to vector<4x64xf32>
    %cst = arith.constant 0.000000e+00 : f32
    %2 = vector.broadcast %cst : f32 to vector<16x60xf32>
    %c0_2 = arith.constant 0 : index
    %c0_3 = arith.constant 0 : index
    %c0_4 = arith.constant 0 : index
    %3 = vector.load %arg2[%c0_2, %c0_3, %c0_4] : memref<5x16x4xf32, #tpu.memory_space<vmem>>, vector<1x16x4xf32>
    %4 = vector.shape_cast %3 : vector<1x16x4xf32> to vector<16x4xf32>
    %5 = vector.extract_strided_slice %1 {offsets = [0, 0], sizes = [4, 60], strides = [1, 1]} : vector<4x64xf32> to vector<4x60xf32>
    %cst_5 = arith.constant dense<0.000000e+00> : vector<16x60xf32>
    %6 = tpu.matmul %4, %5, %cst_5 {dimension_numbers = #tpu.dot_dimension_numbers<[1], [0], [0], [1], [0, 0, 1, 1], [], []>} : vector<16x4xf32>, vector<4x60xf32>, vector<16x60xf32> -> vector<16x60xf32>
    %7 = arith.addf %2, %6 : vector<16x60xf32>
    %c1 = arith.constant 1 : index
    %c0_6 = arith.constant 0 : index
    %c0_7 = arith.constant 0 : index
    %8 = vector.load %arg2[%c1, %c0_6, %c0_7] : memref<5x16x4xf32, #tpu.memory_space<vmem>>, vector<1x16x4xf32>
    %9 = vector.shape_cast %8 : vector<1x16x4xf32> to vector<16x4xf32>
    %10 = vector.extract_strided_slice %1 {offsets = [0, 1], sizes = [4, 60], strides = [1, 1]} : vector<4x64xf32> to vector<4x60xf32>
    %cst_8 = arith.constant dense<0.000000e+00> : vector<16x60xf32>
    %11 = tpu.matmul %9, %10, %cst_8 {dimension_numbers = #tpu.dot_dimension_numbers<[1], [0], [0], [1], [0, 0, 1, 1], [], []>} : vector<16x4xf32>, vector<4x60xf32>, vector<16x60xf32> -> vector<16x60xf32>
    %12 = arith.addf %7, %11 : vector<16x60xf32>
    %c2 = arith.constant 2 : index
    %c0_9 = arith.constant 0 : index
    %c0_10 = arith.constant 0 : index
    %13 = vector.load %arg2[%c2, %c0_9, %c0_10] : memref<5x16x4xf32, #tpu.memory_space<vmem>>, vector<1x16x4xf32>
    %14 = vector.shape_cast %13 : vector<1x16x4xf32> to vector<16x4xf32>
    %15 = vector.extract_strided_slice %1 {offsets = [0, 2], sizes = [4, 60], strides = [1, 1]} : vector<4x64xf32> to vector<4x60xf32>
    %cst_11 = arith.constant dense<0.000000e+00> : vector<16x60xf32>
    %16 = tpu.matmul %14, %15, %cst_11 {dimension_numbers = #tpu.dot_dimension_numbers<[1], [0], [0], [1], [0, 0, 1, 1], [], []>} : vector<16x4xf32>, vector<4x60xf32>, vector<16x60xf32> -> vector<16x60xf32>
    %17 = arith.addf %12, %16 : vector<16x60xf32>
    %c3 = arith.constant 3 : index
    %c0_12 = arith.constant 0 : index
    %c0_13 = arith.constant 0 : index
    %18 = vector.load %arg2[%c3, %c0_12, %c0_13] : memref<5x16x4xf32, #tpu.memory_space<vmem>>, vector<1x16x4xf32>
    %19 = vector.shape_cast %18 : vector<1x16x4xf32> to vector<16x4xf32>
    %20 = vector.extract_strided_slice %1 {offsets = [0, 3], sizes = [4, 60], strides = [1, 1]} : vector<4x64xf32> to vector<4x60xf32>
    %cst_14 = arith.constant dense<0.000000e+00> : vector<16x60xf32>
    %21 = tpu.matmul %19, %20, %cst_14 {dimension_numbers = #tpu.dot_dimension_numbers<[1], [0], [0], [1], [0, 0, 1, 1], [], []>} : vector<16x4xf32>, vector<4x60xf32>, vector<16x60xf32> -> vector<16x60xf32>
    %22 = arith.addf %17, %21 : vector<16x60xf32>
    %c4 = arith.constant 4 : index
    %c0_15 = arith.constant 0 : index
    %c0_16 = arith.constant 0 : index
    %23 = vector.load %arg2[%c4, %c0_15, %c0_16] : memref<5x16x4xf32, #tpu.memory_space<vmem>>, vector<1x16x4xf32>
    %24 = vector.shape_cast %23 : vector<1x16x4xf32> to vector<16x4xf32>
    %25 = vector.extract_strided_slice %1 {offsets = [0, 4], sizes = [4, 60], strides = [1, 1]} : vector<4x64xf32> to vector<4x60xf32>
    %cst_17 = arith.constant dense<0.000000e+00> : vector<16x60xf32>
    %26 = tpu.matmul %24, %25, %cst_17 {dimension_numbers = #tpu.dot_dimension_numbers<[1], [0], [0], [1], [0, 0, 1, 1], [], []>} : vector<16x4xf32>, vector<4x60xf32>, vector<16x60xf32> -> vector<16x60xf32>
    %27 = arith.addf %22, %26 : vector<16x60xf32>
    %c0_18 = arith.constant 0 : index
    %c0_19 = arith.constant 0 : index
    %28 = vector.load %arg3[%c0_18, %c0_19] : memref<16x1xf32, #tpu.memory_space<vmem>>, vector<16x1xf32>
    %29 = vector.broadcast %28 : vector<16x1xf32> to vector<16x60xf32>
    %30 = arith.mulf %27, %29 : vector<16x60xf32>
    %c0_20 = arith.constant 0 : index
    %c0_21 = arith.constant 0 : index
    %31 = vector.load %arg4[%c0_20, %c0_21] : memref<16x1xf32, #tpu.memory_space<vmem>>, vector<16x1xf32>
    %32 = vector.broadcast %31 : vector<16x1xf32> to vector<16x60xf32>
    %33 = arith.addf %30, %32 : vector<16x60xf32>
    %cst_22 = arith.constant 0.000000e+00 : f32
    %34 = vector.broadcast %cst_22 : f32 to vector<16x60xf32>
    %35 = arith.cmpf oge, %33, %34 : vector<16x60xf32>
    %cst_23 = arith.constant 2.000000e-01 : f32
    %36 = vector.broadcast %cst_23 : f32 to vector<16x60xf32>
    %37 = arith.mulf %36, %33 : vector<16x60xf32>
    %38 = arith.select %35, %33, %37 : vector<16x60xi1>, vector<16x60xf32>
    %c0_24 = arith.constant 0 : index
    %c0_25 = arith.constant 0 : index
    %c0_26 = arith.constant 0 : index
    %39 = vector.load %arg5[%c0_24, %c0_25, %c0_26] : memref<1x16x60xf32, #tpu.memory_space<vmem>>, vector<1x16x60xf32>
    %40 = vector.shape_cast %39 : vector<1x16x60xf32> to vector<16x60xf32>
    %41 = vector.shape_cast %38 : vector<16x60xf32> to vector<1x16x60xf32>
    tpu.vector_store %arg5[%c0_24, %c0_25, %c0_26], %41 {strides = array<i32>} : memref<1x16x60xf32, #tpu.memory_space<vmem>>, vector<1x16x60xf32>,
    return
  }
  func.func @transform_0(%arg0: i32) -> (i32, i32, i32) {
    %c0_i32 = arith.constant 0 : i32
    %c0_i32_0 = arith.constant 0 : i32
    %c0_i32_1 = arith.constant 0 : i32
    return %arg0, %c0_i32, %c0_i32_0 : i32, i32, i32
  }
  func.func @transform_1(%arg0: i32) -> (i32, i32, i32) {
    %c0_i32 = arith.constant 0 : i32
    %c0_i32_0 = arith.constant 0 : i32
    %c0_i32_1 = arith.constant 0 : i32
    %c0_i32_2 = arith.constant 0 : i32
    return %c0_i32, %c0_i32_0, %c0_i32_1 : i32, i32, i32
  }
  func.func @transform_2(%arg0: i32) -> (i32, i32) {
    %c0_i32 = arith.constant 0 : i32
    %c0_i32_0 = arith.constant 0 : i32
    %c0_i32_1 = arith.constant 0 : i32
    return %c0_i32, %c0_i32_0 : i32, i32
  }
  func.func @transform_3(%arg0: i32) -> (i32, i32) {
    %c0_i32 = arith.constant 0 : i32
    %c0_i32_0 = arith.constant 0 : i32
    %c0_i32_1 = arith.constant 0 : i32
    return %c0_i32, %c0_i32_0 : i32, i32
  }
  func.func @transform_4(%arg0: i32) -> (i32, i32, i32) {
    %c0_i32 = arith.constant 0 : i32
    %c0_i32_0 = arith.constant 0 : i32
    %c0_i32_1 = arith.constant 0 : i32
    return %arg0, %c0_i32, %c0_i32_0 : i32, i32, i32
  }
}

module attributes {stable_mosaic.version = 11 : i64} {
  func.func @_conv1d_bn_lrelu_kernel(%arg0: i32, %arg1: memref<1x16x60xf32, #tpu.memory_space<vmem>>, %arg2: memref<3x32x16xf32, #tpu.memory_space<vmem>>, %arg3: memref<32x1xf32, #tpu.memory_space<vmem>>, %arg4: memref<32x1xf32, #tpu.memory_space<vmem>>, %arg5: memref<1x32x58xf32, #tpu.memory_space<vmem>>) attributes {dimension_semantics = [#tpu.dimension_semantics<parallel>], iteration_bounds = array<i64: 2>, scalar_prefetch = 0 : i64, scratch_operands = 0 : i64, tpu.core_type = #tpu.core_type<tc>, window_params = [{transform_indices = @transform_0, window_bounds = array<i64: 1, 16, 60>}, {pipeline_mode = #tpu.pipeline_mode<synchronous>, transform_indices = @transform_1, window_bounds = array<i64: 3, 32, 16>}, {pipeline_mode = #tpu.pipeline_mode<synchronous>, transform_indices = @transform_2, window_bounds = array<i64: 32, 1>}, {pipeline_mode = #tpu.pipeline_mode<synchronous>, transform_indices = @transform_3, window_bounds = array<i64: 32, 1>}, {transform_indices = @transform_4, window_bounds = array<i64: 1, 32, 58>}]} {
    %c0 = arith.constant 0 : index
    %c0_0 = arith.constant 0 : index
    %c0_1 = arith.constant 0 : index
    %0 = vector.load %arg1[%c0, %c0_0, %c0_1] : memref<1x16x60xf32, #tpu.memory_space<vmem>>, vector<1x16x60xf32>
    %1 = vector.shape_cast %0 : vector<1x16x60xf32> to vector<16x60xf32>
    %cst = arith.constant 0.000000e+00 : f32
    %2 = vector.broadcast %cst : f32 to vector<32x58xf32>
    %c0_2 = arith.constant 0 : index
    %c0_3 = arith.constant 0 : index
    %c0_4 = arith.constant 0 : index
    %3 = vector.load %arg2[%c0_2, %c0_3, %c0_4] : memref<3x32x16xf32, #tpu.memory_space<vmem>>, vector<1x32x16xf32>
    %4 = vector.shape_cast %3 : vector<1x32x16xf32> to vector<32x16xf32>
    %5 = vector.extract_strided_slice %1 {offsets = [0, 0], sizes = [16, 58], strides = [1, 1]} : vector<16x60xf32> to vector<16x58xf32>
    %cst_5 = arith.constant dense<0.000000e+00> : vector<32x58xf32>
    %6 = tpu.matmul %4, %5, %cst_5 {dimension_numbers = #tpu.dot_dimension_numbers<[1], [0], [0], [1], [0, 0, 1, 1], [], []>} : vector<32x16xf32>, vector<16x58xf32>, vector<32x58xf32> -> vector<32x58xf32>
    %7 = arith.addf %2, %6 : vector<32x58xf32>
    %c1 = arith.constant 1 : index
    %c0_6 = arith.constant 0 : index
    %c0_7 = arith.constant 0 : index
    %8 = vector.load %arg2[%c1, %c0_6, %c0_7] : memref<3x32x16xf32, #tpu.memory_space<vmem>>, vector<1x32x16xf32>
    %9 = vector.shape_cast %8 : vector<1x32x16xf32> to vector<32x16xf32>
    %10 = vector.extract_strided_slice %1 {offsets = [0, 1], sizes = [16, 58], strides = [1, 1]} : vector<16x60xf32> to vector<16x58xf32>
    %cst_8 = arith.constant dense<0.000000e+00> : vector<32x58xf32>
    %11 = tpu.matmul %9, %10, %cst_8 {dimension_numbers = #tpu.dot_dimension_numbers<[1], [0], [0], [1], [0, 0, 1, 1], [], []>} : vector<32x16xf32>, vector<16x58xf32>, vector<32x58xf32> -> vector<32x58xf32>
    %12 = arith.addf %7, %11 : vector<32x58xf32>
    %c2 = arith.constant 2 : index
    %c0_9 = arith.constant 0 : index
    %c0_10 = arith.constant 0 : index
    %13 = vector.load %arg2[%c2, %c0_9, %c0_10] : memref<3x32x16xf32, #tpu.memory_space<vmem>>, vector<1x32x16xf32>
    %14 = vector.shape_cast %13 : vector<1x32x16xf32> to vector<32x16xf32>
    %15 = vector.extract_strided_slice %1 {offsets = [0, 2], sizes = [16, 58], strides = [1, 1]} : vector<16x60xf32> to vector<16x58xf32>
    %cst_11 = arith.constant dense<0.000000e+00> : vector<32x58xf32>
    %16 = tpu.matmul %14, %15, %cst_11 {dimension_numbers = #tpu.dot_dimension_numbers<[1], [0], [0], [1], [0, 0, 1, 1], [], []>} : vector<32x16xf32>, vector<16x58xf32>, vector<32x58xf32> -> vector<32x58xf32>
    %17 = arith.addf %12, %16 : vector<32x58xf32>
    %c0_12 = arith.constant 0 : index
    %c0_13 = arith.constant 0 : index
    %18 = vector.load %arg3[%c0_12, %c0_13] : memref<32x1xf32, #tpu.memory_space<vmem>>, vector<32x1xf32>
    %19 = vector.broadcast %18 : vector<32x1xf32> to vector<32x58xf32>
    %20 = arith.mulf %17, %19 : vector<32x58xf32>
    %c0_14 = arith.constant 0 : index
    %c0_15 = arith.constant 0 : index
    %21 = vector.load %arg4[%c0_14, %c0_15] : memref<32x1xf32, #tpu.memory_space<vmem>>, vector<32x1xf32>
    %22 = vector.broadcast %21 : vector<32x1xf32> to vector<32x58xf32>
    %23 = arith.addf %20, %22 : vector<32x58xf32>
    %cst_16 = arith.constant 0.000000e+00 : f32
    %24 = vector.broadcast %cst_16 : f32 to vector<32x58xf32>
    %25 = arith.cmpf oge, %23, %24 : vector<32x58xf32>
    %cst_17 = arith.constant 2.000000e-01 : f32
    %26 = vector.broadcast %cst_17 : f32 to vector<32x58xf32>
    %27 = arith.mulf %26, %23 : vector<32x58xf32>
    %28 = arith.select %25, %23, %27 : vector<32x58xi1>, vector<32x58xf32>
    %c0_18 = arith.constant 0 : index
    %c0_19 = arith.constant 0 : index
    %c0_20 = arith.constant 0 : index
    %29 = vector.load %arg5[%c0_18, %c0_19, %c0_20] : memref<1x32x58xf32, #tpu.memory_space<vmem>>, vector<1x32x58xf32>
    %30 = vector.shape_cast %29 : vector<1x32x58xf32> to vector<32x58xf32>
    %31 = vector.shape_cast %28 : vector<32x58xf32> to vector<1x32x58xf32>
    tpu.vector_store %arg5[%c0_18, %c0_19, %c0_20], %31 {strides = array<i32>} : memref<1x32x58xf32, #tpu.memory_space<vmem>>, vector<1x32x58xf32>,
    return
  }
  func.func @transform_0(%arg0: i32) -> (i32, i32, i32) {
    %c0_i32 = arith.constant 0 : i32
    %c0_i32_0 = arith.constant 0 : i32
    %c0_i32_1 = arith.constant 0 : i32
    return %arg0, %c0_i32, %c0_i32_0 : i32, i32, i32
  }
  func.func @transform_1(%arg0: i32) -> (i32, i32, i32) {
    %c0_i32 = arith.constant 0 : i32
    %c0_i32_0 = arith.constant 0 : i32
    %c0_i32_1 = arith.constant 0 : i32
    %c0_i32_2 = arith.constant 0 : i32
    return %c0_i32, %c0_i32_0, %c0_i32_1 : i32, i32, i32
  }
  func.func @transform_2(%arg0: i32) -> (i32, i32) {
    %c0_i32 = arith.constant 0 : i32
    %c0_i32_0 = arith.constant 0 : i32
    %c0_i32_1 = arith.constant 0 : i32
    return %c0_i32, %c0_i32_0 : i32, i32
  }
  func.func @transform_3(%arg0: i32) -> (i32, i32) {
    %c0_i32 = arith.constant 0 : i32
    %c0_i32_0 = arith.constant 0 : i32
    %c0_i32_1 = arith.constant 0 : i32
    return %c0_i32, %c0_i32_0 : i32, i32
  }
  func.func @transform_4(%arg0: i32) -> (i32, i32, i32) {
    %c0_i32 = arith.constant 0 : i32
    %c0_i32_0 = arith.constant 0 : i32
    %c0_i32_1 = arith.constant 0 : i32
    return %arg0, %c0_i32, %c0_i32_0 : i32, i32, i32
  }
}

module attributes {stable_mosaic.version = 11 : i64} {
  func.func @_linear_kernel(%arg0: i32, %arg1: memref<2x1856xf32, #tpu.memory_space<vmem>>, %arg2: memref<1856x64xf32, #tpu.memory_space<vmem>>, %arg3: memref<1x64xf32, #tpu.memory_space<vmem>>, %arg4: memref<2x64xf32, #tpu.memory_space<vmem>>) attributes {dimension_semantics = [#tpu.dimension_semantics<arbitrary>], iteration_bounds = array<i64: 1>, scalar_prefetch = 0 : i64, scratch_operands = 0 : i64, tpu.core_type = #tpu.core_type<tc>, window_params = [{pipeline_mode = #tpu.pipeline_mode<synchronous>, transform_indices = @transform_0, window_bounds = array<i64: 2, 1856>}, {pipeline_mode = #tpu.pipeline_mode<synchronous>, transform_indices = @transform_1, window_bounds = array<i64: 1856, 64>}, {pipeline_mode = #tpu.pipeline_mode<synchronous>, transform_indices = @transform_2, window_bounds = array<i64: 1, 64>}, {pipeline_mode = #tpu.pipeline_mode<synchronous>, transform_indices = @transform_3, window_bounds = array<i64: 2, 64>}]} {
    %c0 = arith.constant 0 : index
    %c0_0 = arith.constant 0 : index
    %0 = vector.load %arg1[%c0, %c0_0] : memref<2x1856xf32, #tpu.memory_space<vmem>>, vector<2x1856xf32>
    %c0_1 = arith.constant 0 : index
    %c0_2 = arith.constant 0 : index
    %1 = vector.load %arg2[%c0_1, %c0_2] : memref<1856x64xf32, #tpu.memory_space<vmem>>, vector<1856x64xf32>
    %cst = arith.constant dense<0.000000e+00> : vector<2x64xf32>
    %2 = tpu.matmul %0, %1, %cst {dimension_numbers = #tpu.dot_dimension_numbers<[1], [0], [0], [1], [0, 0, 1, 1], [], []>} : vector<2x1856xf32>, vector<1856x64xf32>, vector<2x64xf32> -> vector<2x64xf32>
    %c0_3 = arith.constant 0 : index
    %c0_4 = arith.constant 0 : index
    %3 = vector.load %arg3[%c0_3, %c0_4] : memref<1x64xf32, #tpu.memory_space<vmem>>, vector<1x64xf32>
    %4 = vector.broadcast %3 : vector<1x64xf32> to vector<2x64xf32>
    %5 = arith.addf %2, %4 : vector<2x64xf32>
    %cst_5 = arith.constant 0.000000e+00 : f32
    %6 = vector.broadcast %cst_5 : f32 to vector<2x64xf32>
    %7 = arith.maximumf %5, %6 : vector<2x64xf32>
    %c0_6 = arith.constant 0 : index
    %c0_7 = arith.constant 0 : index
    %8 = vector.load %arg4[%c0_6, %c0_7] : memref<2x64xf32, #tpu.memory_space<vmem>>, vector<2x64xf32>
    tpu.vector_store %arg4[%c0_6, %c0_7], %7 {strides = array<i32>} : memref<2x64xf32, #tpu.memory_space<vmem>>, vector<2x64xf32>,
    return
  }
  func.func @transform_0(%arg0: i32) -> (i32, i32) {
    %c0_i32 = arith.constant 0 : i32
    %c0_i32_0 = arith.constant 0 : i32
    %c0_i32_1 = arith.constant 0 : i32
    return %c0_i32, %c0_i32_0 : i32, i32
  }
  func.func @transform_1(%arg0: i32) -> (i32, i32) {
    %c0_i32 = arith.constant 0 : i32
    %c0_i32_0 = arith.constant 0 : i32
    %c0_i32_1 = arith.constant 0 : i32
    return %c0_i32, %c0_i32_0 : i32, i32
  }
  func.func @transform_2(%arg0: i32) -> (i32, i32) {
    %c0_i32 = arith.constant 0 : i32
    %c0_i32_0 = arith.constant 0 : i32
    %c0_i32_1 = arith.constant 0 : i32
    return %c0_i32, %c0_i32_0 : i32, i32
  }
  func.func @transform_3(%arg0: i32) -> (i32, i32) {
    %c0_i32 = arith.constant 0 : i32
    %c0_i32_0 = arith.constant 0 : i32
    %c0_i32_1 = arith.constant 0 : i32
    return %c0_i32, %c0_i32_0 : i32, i32
  }
}

module attributes {stable_mosaic.version = 11 : i64} {
  func.func @_linear_kernel(%arg0: i32, %arg1: memref<2x64xf32, #tpu.memory_space<vmem>>, %arg2: memref<64x10xf32, #tpu.memory_space<vmem>>, %arg3: memref<1x10xf32, #tpu.memory_space<vmem>>, %arg4: memref<2x10xf32, #tpu.memory_space<vmem>>) attributes {dimension_semantics = [#tpu.dimension_semantics<arbitrary>], iteration_bounds = array<i64: 1>, scalar_prefetch = 0 : i64, scratch_operands = 0 : i64, tpu.core_type = #tpu.core_type<tc>, window_params = [{pipeline_mode = #tpu.pipeline_mode<synchronous>, transform_indices = @transform_0, window_bounds = array<i64: 2, 64>}, {pipeline_mode = #tpu.pipeline_mode<synchronous>, transform_indices = @transform_1, window_bounds = array<i64: 64, 10>}, {pipeline_mode = #tpu.pipeline_mode<synchronous>, transform_indices = @transform_2, window_bounds = array<i64: 1, 10>}, {pipeline_mode = #tpu.pipeline_mode<synchronous>, transform_indices = @transform_3, window_bounds = array<i64: 2, 10>}]} {
    %c0 = arith.constant 0 : index
    %c0_0 = arith.constant 0 : index
    %0 = vector.load %arg1[%c0, %c0_0] : memref<2x64xf32, #tpu.memory_space<vmem>>, vector<2x64xf32>
    %c0_1 = arith.constant 0 : index
    %c0_2 = arith.constant 0 : index
    %1 = vector.load %arg2[%c0_1, %c0_2] : memref<64x10xf32, #tpu.memory_space<vmem>>, vector<64x10xf32>
    %cst = arith.constant dense<0.000000e+00> : vector<2x10xf32>
    %2 = tpu.matmul %0, %1, %cst {dimension_numbers = #tpu.dot_dimension_numbers<[1], [0], [0], [1], [0, 0, 1, 1], [], []>} : vector<2x64xf32>, vector<64x10xf32>, vector<2x10xf32> -> vector<2x10xf32>
    %c0_3 = arith.constant 0 : index
    %c0_4 = arith.constant 0 : index
    %3 = vector.load %arg3[%c0_3, %c0_4] : memref<1x10xf32, #tpu.memory_space<vmem>>, vector<1x10xf32>
    %4 = vector.broadcast %3 : vector<1x10xf32> to vector<2x10xf32>
    %5 = arith.addf %2, %4 : vector<2x10xf32>
    %cst_5 = arith.constant dense<0xFF800000> : vector<2xf32>
    %6 = vector.multi_reduction <maximumf>, %5, %cst_5 [1] : vector<2x10xf32> to vector<2xf32>
    %7 = vector.shape_cast %6 : vector<2xf32> to vector<2x1xf32>
    %8 = vector.broadcast %7 : vector<2x1xf32> to vector<2x10xf32>
    %9 = arith.subf %5, %8 : vector<2x10xf32>
    %10 = vector.broadcast %7 : vector<2x1xf32> to vector<2x10xf32>
    %11 = arith.subf %5, %10 : vector<2x10xf32>
    %12 = math.exp %11 : vector<2x10xf32>
    %cst_6 = arith.constant dense<0.000000e+00> : vector<2xf32>
    %13 = vector.multi_reduction <add>, %12, %cst_6 [1] : vector<2x10xf32> to vector<2xf32>
    %14 = vector.shape_cast %13 : vector<2xf32> to vector<2x1xf32>
    %15 = math.log %14 : vector<2x1xf32>
    %16 = vector.broadcast %15 : vector<2x1xf32> to vector<2x10xf32>
    %17 = arith.subf %9, %16 : vector<2x10xf32>
    %c0_7 = arith.constant 0 : index
    %c0_8 = arith.constant 0 : index
    %18 = vector.load %arg4[%c0_7, %c0_8] : memref<2x10xf32, #tpu.memory_space<vmem>>, vector<2x10xf32>
    tpu.vector_store %arg4[%c0_7, %c0_8], %17 {strides = array<i32>} : memref<2x10xf32, #tpu.memory_space<vmem>>, vector<2x10xf32>,
    return
  }
  func.func @transform_0(%arg0: i32) -> (i32, i32) {
    %c0_i32 = arith.constant 0 : i32
    %c0_i32_0 = arith.constant 0 : i32
    %c0_i32_1 = arith.constant 0 : i32
    return %c0_i32, %c0_i32_0 : i32, i32
  }
  func.func @transform_1(%arg0: i32) -> (i32, i32) {
    %c0_i32 = arith.constant 0 : i32
    %c0_i32_0 = arith.constant 0 : i32
    %c0_i32_1 = arith.constant 0 : i32
    return %c0_i32, %c0_i32_0 : i32, i32
  }
  func.func @transform_2(%arg0: i32) -> (i32, i32) {
    %c0_i32 = arith.constant 0 : i32
    %c0_i32_0 = arith.constant 0 : i32
    %c0_i32_1 = arith.constant 0 : i32
    return %c0_i32, %c0_i32_0 : i32, i32
  }
  func.func @transform_3(%arg0: i32) -> (i32, i32) {
    %c0_i32 = arith.constant 0 : i32
    %c0_i32_0 = arith.constant 0 : i32
    %c0_i32_1 = arith.constant 0 : i32
    return %c0_i32, %c0_i32_0 : i32, i32
  }
}

</mosaic_0001>

<bundles_post_ra>
// kernel: cnn1d_leakyrelu_notpool_forward.4
= control target key start
LH: loop header
LB: loop body
LE: loop exit
PB: predicated region body
PF: predicated region fallthrough
CT: control target
= control target key end

     0   :  { %s563_s15 = smov 0   ;;  %s642_s0 = inlined_call_operand.vmem [shape: f32[2,4,64], index: 0, kind: input, shape index: {}]   ;;  %s643_s1 = inlined_call_operand.vmem [shape: f32[5,16,4], index: 1, kind: input, shape index: {}]   ;;  %s644_s2 = inlined_call_operand.vmem [shape: f32[16,1], index: 2, kind: input, shape index: {}]   ;;  %s645_s3 = inlined_call_operand.vmem [shape: f32[16,1], index: 3, kind: input, shape index: {}]   ;;  %s646_s4 = inlined_call_operand.vmem [shape: f32[2,16,60], index: 4, kind: output, shape index: {}]  }
   0x1 LB: > { %s474_s16 = sadd.s32 4294967295, %s531_s15   ;;  %p478_p0 = scmp.ge.s32.totalorder %s531_s15, 1  ;;  %s531_s15 = sphi %s563_s15, %s14_s15  }
   0x2   : > { %p161_p1 = scmp.lt.s32.totalorder %s531_s15, 3 }
   0x4   : > { %p162_p2 = pnand %p478_p0, %p161_p1 }
   0x5   : > { %p186_p3 = scmp.lt.s32.totalorder (!%p162_p2), %s474_s16, 1  ;;  %s533_s21 = smov (!%p162_p2), 127  }
   0x6   : > { %165 = sbr.rel (%p162_p2) target bundleno = 293 (0x125), region = 36  ;;  %s534_s22 = smov (!%p162_p2), 125  }
   0x7   : > { %s535_s23 = smov (!%p162_p2), 126   ;;  %s536_s24 = smov (!%p162_p2), 124  }
   0xb   : > { %s648_s16 = smov (!%p186_p3, %s474_s16), 1  ;;  %v396_v1 = vld [vmem:[%s645_s3] sm:$0xff]  ;;  %v397_v2 = vld [vmem:[%s645_s3 + $0x8] sm:$0xff]  ;;  %v537_v3 = vmov 0   ;;  %vm211_vm0 = vcmask 1043456   ;;  %v483_v6 = vld [vmem:[%s643_s1 + $0x18] sm:$0xff] }
   0xc   : > { %s479_s17 = sshll.u32 %s648_s16, 2  ;;  %523 = vset.pattern.permute.xlu0 %v537_v3  ;;  %524 = vset.pattern.permute.xlu1 %v537_v3  ;;  %v382_v4 = vld [vmem:[%s644_s2] sm:$0xff]  ;;  %v383_v5 = vld [vmem:[%s644_s2 + $0x8] sm:$0xff]  ;;  %vm204_vm1 = vcmask 31744   ;;  %v482_v9 = vld [vmem:[%s643_s1 + $0x10] sm:$0xff]  ;;  %s507_s29 = sshll.u32 %s648_s16, 4 }
   0xd   : > { %s189_s20 = scalar_lea.vmem %s642_s0, %s479_s17  ;;  %522 = vset.pattern.permute.xlu2 %v537_v3  ;;  %v495_v10 = vld [vmem:[%s643_s1 + $0x30] sm:$0xff]  ;;  %v196_v11 = vld [vmem:[%s643_s1] sm:$0xff]  ;;  %v496_v16 = vld [vmem:[%s643_s1 + $0x38] sm:$0xff]  ;;  %s194_s6 = scalar_lea.vmem %s646_s4, %s507_s29  ;;  %vm416_vm2 = vcmask 490496  }
   0xe   : > { %v195_v0 = vld [vmem:[%s189_s20] sm:$0xf]  ;;  %386 = vperm.xlu2 %522, %v382_v4   ;;  %v197_v17 = vld [vmem:[%s643_s1 + $0x8] sm:$0xff] }
   0xf   : > { %202 = vrot.lane.b32.xlu0 %v195_v0, %s533_s21  ;;  %309 = vrot.lane.b32.xlu1 %v195_v0, %s534_s22  ;;  %v490_v12 = vld [vmem:[%s643_s1 + $0x20] sm:$0xff]  ;;  %v491_v18 = vld [vmem:[%s643_s1 + $0x28] sm:$0xff] }
  0x10   : > { %v500_v15 = vld [vmem:[%s643_s1 + $0x40] sm:$0xff]  ;;  %v501_v19 = vld [vmem:[%s643_s1 + $0x48] sm:$0xff] }
  0x16   : > { %391 = vperm.xlu2 %522, %v383_v5  }
  0x17   : > { %271 = vrot.lane.b32.xlu0 %v195_v0, %s535_s23  ;;  %347 = vrot.lane.b32.xlu1 %v195_v0, %s536_s24 }
  0x1f   : > { %400 = vperm.xlu0 %523, %v396_v1   ;;  %405 = vperm.xlu1 %524, %v397_v2  }
  0x68   : > { %v387_v29 = vpop.permute.xlu2 %386 }
  0x70   : > { %v392_v44 = vpop.permute.xlu2 %391 }
  0x81   : > { %v203_v7 = vpop.permute.xlu0 %202  ;;  %v310_v8 = vpop.permute.xlu1 %309 }
  0x82   : > { %484 = vmatpush.msk.msra.mxu0 %vm211_vm0, %v203_v7  ;;  %508 = vmatpush.msk.msra.mxu1 %vm211_vm0, %v203_v7 }
  0x83   : > { %486 = vmatmul.msk.f32.vlgmr.msra.gmra.mxu1 %vm204_vm1, %v483_v6  ;;  %497 = vmatpush.msk.msra.mxu3 %vm211_vm0, %v310_v8 }
  0x84   : > { %487 = vmatpush.msk.msrb.mxu1 %vm211_vm0, %v195_v0  ;;  %485 = vmatmul.msk.f32.vlgmr.msra.gmra.mxu0 %vm204_vm1, %v482_v9 }
  0x85   : > { %498 = vmatmul.msk.f32.vlgmr.msra.gmra.mxu3 %vm204_vm1, %v495_v10 }
  0x89   : > { %v272_v13 = vpop.permute.xlu0 %271  ;;  %v348_v14 = vpop.permute.xlu1 %347 }
  0x8a   : > { %492 = vmatpush.msk.msra.mxu2 %vm211_vm0, %v272_v13  ;;  %502 = vmatpush.msk.msrb.mxu0 %vm211_vm0, %v348_v14 }
  0x8b   : > { %488 = vmatmul.msk.f32.vlgmr.msrb.gmra.mxu1 %vm204_vm1, %v196_v11  ;;  %493 = vmatmul.msk.f32.vlgmr.msra.gmra.mxu2 %vm204_vm1, %v490_v12 }
  0x8c   : > { %503 = vmatmul.msk.f32.vlgmr.msrb.gmra.mxu0 %vm204_vm1, %v500_v15 }
  0x8d   : > { %499 = vmatmul.msk.f32.gmra.mxu3 %vm204_vm1, %v496_v16 }
  0x91   : > { %v401_v32 = vpop.permute.xlu0 %400  ;;  %v406_v45 = vpop.permute.xlu1 %405 }
  0x93   : > { %489 = vmatmul.msk.f32.gmra.mxu1 %vm204_vm1, %v197_v17  ;;  %494 = vmatmul.msk.f32.gmra.mxu2 %vm204_vm1, %v491_v18 }
  0x94   : > { %504 = vmatmul.msk.f32.gmra.mxu0 %vm204_vm1, %v501_v19 }
 0x100   : > { %v234_v20 = vpop.f32.mrf.mxu1 }
 0x101   : > { %v231_v21 = vpop.f32.mrf.mxu0 }
 0x108   : > { %v262_v22 = vpop.f32.mrf.mxu1  ;;  %v336_v23 = vpop.f32.mrf.mxu3 }
 0x109   : > { %v263_v24 = vadd.f32 %v262_v22, %v231_v21  ;;  %v374_v26 = vpop.f32.mrf.mxu0 }
 0x10e   : > { %v298_v25 = vpop.f32.mrf.mxu2 }
 0x10f   : > { %v304_v27 = vadd.f32 %v298_v25, %v263_v24 }
 0x110   : > { %v265_v30 = vpop.f32.mrf.mxu1  ;;  %v339_v36 = vpop.f32.mrf.mxu3 }
 0x111   : > { %v342_v28 = vadd.f32 %v336_v23, %v304_v27  ;;  %v266_v33 = vadd.f32 %v265_v30, %v234_v20  ;;  %v377_v39 = vpop.f32.mrf.mxu0 }
 0x113   : > { %v380_v31 = vadd.f32 %v374_v26, %v342_v28 }
 0x115   : > { %v394_v34 = vmul.f32 %v387_v29, %v380_v31 }
 0x116   : > { %v301_v35 = vpop.f32.mrf.mxu2 }
 0x117   : > { %v305_v37 = vadd.f32 %v301_v35, %v266_v33  ;;  %v408_v38 = vadd.f32 %v401_v32, %v394_v34 }
 0x119   : > { %vm410_vm3 = vcmp.ge.f32.partialorder %v408_v38, 0.0  ;;  %v412_v40 = vmul.f32 0.2, %v408_v38  ;;  %v343_v41 = vadd.f32 %v339_v36, %v305_v37 }
 0x11b   : > { %v414_v42 = vsel %vm410_vm3, %v408_v38, %v412_v40  ;;  %v381_v43 = vadd.f32 %v377_v39, %v343_v41 }
 0x11c   : > { %417 = vst.msk [vmem:[%s194_s6] sm:$0xff] %vm416_vm2, %v414_v42 }
 0x11d   : > { %v395_v46 = vmul.f32 %v392_v44, %v381_v43 }
 0x11f   : > { %v409_v47 = vadd.f32 %v406_v45, %v395_v46 }
 0x121   : > { %vm411_vm4 = vcmp.ge.f32.partialorder %v409_v47, 0.0  ;;  %v413_v48 = vmul.f32 0.2, %v409_v47 }
 0x123   : > { %v415_v49 = vsel %vm411_vm4, %v409_v47, %v413_v48 }
 0x124   : > { %418 = vst.msk [vmem:[%s194_s6 + $0x8] sm:$0xff] %vm416_vm2, %v415_v49 }
 0x125 PF: > { %s14_s15 = sadd.s32 1, %s531_s15  }
 0x126   : > { %p11_p4 = scmp.ge.s32.totalorder %s14_s15, 4  }
 0x128   :  { %13 = sbr.rel (!%p11_p4) target bundleno = 1 (0x1), region = 70 }

// kernel: cnn1d_leakyrelu_notpool_forward.5
= control target key start
LH: loop header
LB: loop body
LE: loop exit
PB: predicated region body
PF: predicated region fallthrough
CT: control target
= control target key end

     0   :  { %s583_s15 = smov 0   ;;  %s686_s0 = inlined_call_operand.vmem [shape: f32[2,16,60], index: 0, kind: input, shape index: {}]   ;;  %s687_s1 = inlined_call_operand.vmem [shape: f32[3,32,16], index: 1, kind: input, shape index: {}]   ;;  %s688_s2 = inlined_call_operand.vmem [shape: f32[32,1], index: 2, kind: input, shape index: {}]   ;;  %s689_s3 = inlined_call_operand.vmem [shape: f32[32,1], index: 3, kind: input, shape index: {}]   ;;  %s690_s4 = inlined_call_operand.vmem [shape: f32[2,32,58], index: 4, kind: output, shape index: {}]  }
   0x1 LB: > { %s484_s16 = sadd.s32 4294967295, %s553_s15   ;;  %p488_p0 = scmp.ge.s32.totalorder %s553_s15, 1  ;;  %s553_s15 = sphi %s583_s15, %s14_s15  }
   0x2   : > { %p162_p1 = scmp.lt.s32.totalorder %s553_s15, 3 }
   0x4   : > { %p163_p2 = pnand %p488_p0, %p162_p1 }
   0x5   : > { %p188_p3 = scmp.lt.s32.totalorder (!%p163_p2), %s484_s16, 1  ;;  %s555_s21 = smov (!%p163_p2), 127  }
   0x6   : > { %166 = sbr.rel (%p163_p2) target bundleno = 303 (0x12f), region = 36  ;;  %s556_s22 = smov (!%p163_p2), 126  }
   0xb   : > { %s692_s16 = smov (!%p188_p3, %s484_s16), 1  ;;  %v356_v3 = vld [vmem:[%s688_s2] sm:$0xff]  ;;  %v557_v4 = vmov 0   ;;  %v357_v5 = vld [vmem:[%s688_s2 + $0x8] sm:$0xff]  ;;  %vm217_vm0 = vcmask 130048   ;;  %v202_v8 = vld [vmem:[%s687_s1 + $0x10] sm:$0xff] }
   0xc   : > { %s515_s17 = sshll.u32 %s692_s16, 4  ;;  %544 = vset.pattern.permute.xlu1 %v557_v4  ;;  %546 = vset.pattern.permute.xlu0 %v557_v4  ;;  %v201_v6 = vld [vmem:[%s687_s1 + $0x8] sm:$0xff]  ;;  %v387_v9 = vld [vmem:[%s689_s3 + $0x18] sm:$0xff]  ;;  %v384_v11 = vld [vmem:[%s689_s3] sm:$0xff]  ;;  %s516_s13 = sshll.u32 %s692_s16, 5  ;;  %vm424_vm2 = vcmask 474112  }
   0xd   : > { %s192_s20 = scalar_lea.vmem %s686_s0, %s515_s17  ;;  %362 = vperm.xlu1 %544, %v356_v3   ;;  %545 = vset.pattern.permute.xlu2 %v557_v4  ;;  %v385_v7 = vld [vmem:[%s689_s3 + $0x8] sm:$0xff]  ;;  %v203_v10 = vld [vmem:[%s687_s1 + $0x18] sm:$0xff]  ;;  %v358_v12 = vld [vmem:[%s688_s2 + $0x10] sm:$0xff]  ;;  %s673_s18 = scalar_lea.vmem %s690_s4, %s516_s13 }
   0xe   : > { %v198_v0 = vld [vmem:[%s192_s20] sm:$0xff]  ;;  %v199_v1 = vld [vmem:[%s192_s20 + $0x8] sm:$0xff]  ;;  %372 = vperm.xlu2 %545, %v358_v12   ;;  %v359_v18 = vld [vmem:[%s688_s2 + $0x18] sm:$0xff] }
   0xf   : > { %v534_v2 = vpack.i.bf16 %v198_v0, %v199_v1  ;;  %519 = vmatpush.msra.mxu1 %v199_v1  ;;  %v493_v16 = vld [vmem:[%s687_s1 + $0x20] sm:$0xff]  ;;  %v494_v17 = vld [vmem:[%s687_s1 + $0x28] sm:$0xff]  ;;  %v495_v24 = vld [vmem:[%s687_s1 + $0x30] sm:$0xff] }
  0x10   : > { %v200_v22 = vld [vmem:[%s687_s1] sm:$0xff]  ;;  %v506_v23 = vld [vmem:[%s687_s1 + $0x48] sm:$0xff]  ;;  %v386_v25 = vld [vmem:[%s689_s3 + $0x10] sm:$0xff] }
  0x11   : > { %535 = vrot.lane.b32.xlu0 %v534_v2, %s555_s21  ;;  %520 = vmatpush.msra.mxu1 %v198_v0  ;;  %v505_v26 = vld [vmem:[%s687_s1 + $0x40] sm:$0xff]  ;;  %v507_v27 = vld [vmem:[%s687_s1 + $0x50] sm:$0xff]  ;;  %v496_v28 = vld [vmem:[%s687_s1 + $0x38] sm:$0xff] }
  0x12   : > { %502 = vmatmul.msk.f32.vlgmr.msra.gmra.mxu1 %vm217_vm0, %v201_v6  ;;  %v508_v29 = vld [vmem:[%s687_s1 + $0x58] sm:$0xff] }
  0x15   : > { %367 = vperm.xlu1 %544, %v357_v5  }
  0x16   : > { %377 = vperm.xlu2 %545, %v359_v18  }
  0x19   : > { %540 = vrot.lane.b32.xlu0 %v534_v2, %s556_s22 }
  0x1a   : > { %503 = vmatmul.msk.f32.gmra.mxu1 %vm217_vm0, %v202_v8 }
  0x1d   : > { %395 = vperm.xlu1 %544, %v385_v7  }
  0x1e   : > { %400 = vperm.xlu2 %545, %v386_v25  }
  0x21   : > { %390 = vperm.xlu0 %546, %v384_v11  }
  0x22   : > { %504 = vmatmul.msk.f32.gmra.mxu1 %vm217_vm0, %v203_v10 }
  0x25   : > { %405 = vperm.xlu1 %544, %v387_v9  }
  0x68   : > { %v373_v33 = vpop.permute.xlu2 %372 }
  0x70   : > { %v378_v43 = vpop.permute.xlu2 %377 }
  0x78   : > { %v401_v62 = vpop.permute.xlu2 %400 }
  0x7f   : > { %v363_v30 = vpop.permute.xlu1 %362 }
  0x83   : > { %v536_v13 = vpop.permute.xlu0 %535 }
  0x84   : > { %v537_v14 = vunpack.i.l.bf16 %v536_v13  ;;  %v538_v15 = vunpack.i.h.bf16 %v536_v13 }
  0x86   : > { %244 = vmatpush.msra.mxu0 %v537_v14  ;;  %517 = vmatpush.msra.mxu3 %v537_v14 }
  0x87   : > { %v368_v35 = vpop.permute.xlu1 %367 }
  0x88   : > { %245 = vmatpush.msra.mxu0 %v538_v15  ;;  %518 = vmatpush.msra.mxu3 %v538_v15 }
  0x89   : > { %497 = vmatmul.msk.f32.vlgmr.msra.gmra.mxu0 %vm217_vm0, %v493_v16  ;;  %498 = vmatmul.msk.f32.vlgmr.msra.gmra.mxu3 %vm217_vm0, %v494_v17 }
  0x8a   : > { %285 = vmatpush.msrb.mxu0 %v199_v1 }
  0x8b   : > { %v541_v19 = vpop.permute.xlu0 %540 }
  0x8c   : > { %v542_v20 = vunpack.i.l.bf16 %v541_v19  ;;  %286 = vmatpush.msrb.mxu0 %v198_v0  ;;  %v543_v21 = vunpack.i.h.bf16 %v541_v19 }
  0x8e   : > { %337 = vmatpush.msra.mxu0 %v542_v20  ;;  %521 = vmatpush.msra.mxu2 %v542_v20 }
  0x8f   : > { %v291_v32 = vpop.f32.mrf.mxu1  ;;  %v396_v47 = vpop.permute.xlu1 %395 }
  0x90   : > { %338 = vmatpush.msra.mxu0 %v543_v21  ;;  %522 = vmatpush.msra.mxu2 %v543_v21 }
  0x91   : > { %501 = vmatmul.msk.f32.vlgmr.msrb.gmra.mxu0 %vm217_vm0, %v200_v22  ;;  %510 = vmatmul.msk.f32.vlgmr.msra.gmra.mxu2 %vm217_vm0, %v506_v23 }
  0x92   : > { %499 = vmatmul.msk.f32.gmra.mxu3 %vm217_vm0, %v495_v24 }
  0x93   : > { %v391_v48 = vpop.permute.xlu0 %390 }
  0x97   : > { %v294_v40 = vpop.f32.mrf.mxu1  ;;  %v406_v6 = vpop.permute.xlu1 %405 }
  0x99   : > { %509 = vmatmul.msk.f32.vlgmr.msra.gmra.mxu0 %vm217_vm0, %v505_v26  ;;  %511 = vmatmul.msk.f32.gmra.mxu2 %vm217_vm0, %v507_v27 }
  0x9a   : > { %500 = vmatmul.msk.f32.gmra.mxu3 %vm217_vm0, %v496_v28 }
  0x9f   : > { %v297_v59 = vpop.f32.mrf.mxu1 }
  0xa1   : > { %512 = vmatmul.msk.f32.gmra.mxu2 %vm217_vm0, %v508_v29 }
 0x106   : > { %v247_v31 = vpop.f32.mrf.mxu0 }
 0x10c   : > { %v250_v34 = vpop.f32.mrf.mxu3 }
 0x10d   : > { %v292_v37 = vadd.f32 %v291_v32, %v250_v34 }
 0x10e   : > { %v288_v36 = vpop.f32.mrf.mxu0 }
 0x10f   : > { %v289_v38 = vadd.f32 %v288_v36, %v247_v31 }
 0x114   : > { %v343_v39 = vpop.f32.mrf.mxu2 }
 0x115   : > { %v353_v41 = vadd.f32 %v343_v39, %v292_v37  ;;  %v253_v42 = vpop.f32.mrf.mxu3 }
 0x116   : > { %v340_v44 = vpop.f32.mrf.mxu0  ;;  %v295_v51 = vadd.f32 %v294_v40, %v253_v42 }
 0x117   : > { %v381_v45 = vmul.f32 %v368_v35, %v353_v41  ;;  %v352_v46 = vadd.f32 %v340_v44, %v289_v38 }
 0x119   : > { %v409_v49 = vadd.f32 %v396_v47, %v381_v45  ;;  %v380_v50 = vmul.f32 %v363_v30, %v352_v46 }
 0x11b   : > { %vm413_vm1 = vcmp.ge.f32.partialorder %v409_v49, 0.0  ;;  %v417_v52 = vmul.f32 0.2, %v409_v49  ;;  %v408_v53 = vadd.f32 %v391_v48, %v380_v50 }
 0x11c   : > { %v346_v54 = vpop.f32.mrf.mxu2 }
 0x11d   : > { %v421_v55 = vsel %vm413_vm1, %v409_v49, %v417_v52  ;;  %vm412_vm3 = vcmp.ge.f32.partialorder %v408_v53, 0.0  ;;  %v416_v56 = vmul.f32 0.2, %v408_v53  ;;  %v354_v57 = vadd.f32 %v346_v54, %v295_v51  ;;  %v256_v58 = vpop.f32.mrf.mxu3 }
 0x11e   : > { %426 = vst.msk [vmem:[%s673_s18 + $0x8] sm:$0xff] %vm424_vm2, %v421_v55  ;;  %v298_v0 = vadd.f32 %v297_v59, %v256_v58 }
 0x11f   : > { %v420_v60 = vsel %vm412_vm3, %v408_v53, %v416_v56  ;;  %v382_v61 = vmul.f32 %v373_v33, %v354_v57 }
 0x120   : > { %425 = vst.msk [vmem:[%s673_s18] sm:$0xff] %vm424_vm2, %v420_v60 }
 0x121   : > { %v410_v63 = vadd.f32 %v401_v62, %v382_v61 }
 0x123   : > { %vm414_vm4 = vcmp.ge.f32.partialorder %v410_v63, 0.0  ;;  %v418_v1 = vmul.f32 0.2, %v410_v63 }
 0x124   : > { %v349_v2 = vpop.f32.mrf.mxu2 }
 0x125   : > { %v422_v3 = vsel %vm414_vm4, %v410_v63, %v418_v1  ;;  %v355_v4 = vadd.f32 %v349_v2, %v298_v0 }
 0x126   : > { %427 = vst.msk [vmem:[%s673_s18 + $0x10] sm:$0xff] %vm424_vm2, %v422_v3 }
 0x127   : > { %v383_v5 = vmul.f32 %v378_v43, %v355_v4 }
 0x129   : > { %v411_v7 = vadd.f32 %v406_v6, %v383_v5 }
 0x12b   : > { %vm415_vm5 = vcmp.ge.f32.partialorder %v411_v7, 0.0  ;;  %v419_v8 = vmul.f32 0.2, %v411_v7 }
 0x12d   : > { %v423_v9 = vsel %vm415_vm5, %v411_v7, %v419_v8 }
 0x12e   : > { %428 = vst.msk [vmem:[%s673_s18 + $0x18] sm:$0xff] %vm424_vm2, %v423_v9 }
 0x12f PF: > { %s14_s15 = sadd.s32 1, %s553_s15  }
 0x130   : > { %p11_p4 = scmp.ge.s32.totalorder %s14_s15, 4  }
 0x132   :  { %13 = sbr.rel (!%p11_p4) target bundleno = 1 (0x1), region = 68 }

// kernel: cnn1d_leakyrelu_notpool_forward.7
= control target key start
LH: loop header
LB: loop body
LE: loop exit
PB: predicated region body
PF: predicated region fallthrough
CT: control target
= control target key end

     0   :  { %s172_s0 = inlined_call_operand.vmem [shape: f32[2,64], index: 0, kind: input, shape index: {}]   ;;  %s173_s1 = inlined_call_operand.vmem [shape: f32[64,10], index: 1, kind: input, shape index: {}]   ;;  %s174_s2 = inlined_call_operand.vmem [shape: f32[1,10], index: 2, kind: input, shape index: {}]   ;;  %s175_s3 = inlined_call_operand.hbm [shape: f32[2,10], index: 3, kind: output, shape index: {}]  }
   0x1   :  { %v23_v0 = vld [vmem:[%s173_s1 + $0x38] sm:$0xff]  ;;  %v22_v1 = vld [vmem:[%s173_s1 + $0x30] sm:$0xff]  ;;  %v21_v2 = vld [vmem:[%s173_s1 + $0x28] sm:$0xff] }
   0x2   :  { %40 = vmatpush.msra.mxu0 %v23_v0 }
   0x4   :  { %41 = vmatpush.msra.mxu0 %v22_v1 }
   0x5   :  { %8 = vsyncpa [#allocation3], 0  ;;  %v20_v3 = vld [vmem:[%s173_s1 + $0x20] sm:$0xff]  ;;  %v19_v4 = vld [vmem:[%s173_s1 + $0x18] sm:$0xff]  ;;  %vm28_vm0 = vcmask 523264   ;;  %vm52_vm1 = vcmask 74752  }
   0x6   :  { %42 = vmatpush.msra.mxu0 %v21_v2  ;;  %v18_v5 = vld [vmem:[%s173_s1 + $0x10] sm:$0xff]  ;;  %v17_v6 = vld [vmem:[%s173_s1 + $0x8] sm:$0xff]  ;;  %v16_v7 = vld [vmem:[%s173_s1] sm:$0xff]  ;;  %s73_s6 = sshll.u32 %s175_s3, 4  ;;  %s74_s6 = int_to_ptr.hbm [resolvable:$true] %s73_s6 }
   0x7   :  { %v15_v8 = vld [vmem:[%s172_s0] sm:$0x3]  ;;  %s115_s0 = smov [#allocation2]  }
   0x8   :  { %43 = vmatpush.msra.mxu0 %v20_v3  ;;  %v84_v9 = vld [vmem:[%s174_s2] ss:$0 sm:$0xff]  ;;  %s71_s1 = sshll.u32 %s115_s0, 4  ;;  %s72_s1 = int_to_ptr.vmem [resolvable:$true] %s71_s1 }
   0xa   :  { %44 = vmatpush.msra.mxu0 %v19_v4 }
   0xc   :  { %45 = vmatpush.msra.mxu0 %v18_v5 }
   0xe   :  { %46 = vmatpush.msra.mxu0 %v17_v6 }
  0x10   :  { %47 = vmatpush.msra.mxu0 %v16_v7 }
  0x11   :  { %82 = vmatmul.msk.f32.vlgmr.msra.gmra.mxu0 %vm28_vm0, %v15_v8 }
  0x8e   :  { %v49_v10 = vpop.f32.mrf.mxu0 }
  0x8f   :  { %v50_v11 = vadd.f32 %v84_v9, %v49_v10 }
  0x91   :  { %v53_v12 = vsel %vm52_vm1, %v50_v11, -inf }
  0x92   :  { %54 = vmax.xlane.f32.xlu0 %v53_v12 }
 0x105   :  { %v55_v13 = vpop.xlane.xlu0 %54 }
 0x106   :  { %v56_v14 = vsub.f32 %v50_v11, %v55_v13 }
 0x108   :  { %v57_v15 = vmul.f32 1.442695, %v56_v14 }
 0x10a   :  { %85 = vpow2.f32 %v57_v15 }
 0x110   :  { %v86_v16 = vpop.eup %85 }
 0x111   :  { %v59_v17 = vsel %vm52_vm1, %v86_v16, 0.0 }
 0x112   :  { %60 = vadd.xlane.f32.xlu0 %v59_v17 }
 0x185   :  { %v61_v18 = vpop.xlane.xlu0 %60 }
 0x186   :  { %87 = vlog2.f32 %v61_v18 }
 0x18c   :  { %v88_v19 = vpop.eup %87 }
 0x18d   :  { %v63_v20 = vmul.f32 0.6931472, %v88_v19 }
 0x18f   :  { %v64_v21 = vsub.f32 %v56_v14, %v63_v20 }
 0x191   :  { %65 = vst.msk [vmem:[#allocation2] sm:$0x3] %vm52_vm1, %v64_v21 }
 0x192   :  { %76 = dma.vmem_to_hbm [thread:$0]  %s72_s1, 32, %s74_s6, [#allocation3]  }
 0x193   :  { %113 = dma.done.wait [#allocation3], 32  }
 0x194   :  { %114 = vsyncadd [#allocation3], 4294967264 }
 0x195   :  { %81 = vsyncpa [#allocation3], 1 }

// kernel: cnn1d_leakyrelu_notpool_forward.6
= control target key start
LH: loop header
LB: loop body
LE: loop exit
PB: predicated region body
PF: predicated region fallthrough
CT: control target
= control target key end

     0   :  { %vm292_vm0 = vcmask 523264   ;;  %vm596_vm1 = vcmask 517120   ;;  %s1359_s1 = inlined_call_operand.vmem [shape: f32[1856,64], index: 1, kind: input, shape index: {}]   ;;  %s1360_s0 = inlined_call_operand.vmem [shape: f32[2,1856], index: 0, kind: input, shape index: {}]   ;;  %s1361_s2 = inlined_call_operand.vmem [shape: f32[1,64], index: 2, kind: input, shape index: {}]   ;;  %s1362_s3 = inlined_call_operand.vmem [shape: f32[2,64], index: 3, kind: output, shape index: {}]  }
   0x1   :  { %v33_v0 = vld [vmem:[%s1359_s1 + $0x78] sm:$0xff]  ;;  %v32_v2 = vld [vmem:[%s1359_s1 + $0x70] sm:$0xff]  ;;  %v31_v6 = vld [vmem:[%s1359_s1 + $0x68] sm:$0xff] }
   0x2   :  { %v65_v1 = vld [vmem:[%s1359_s1 + $0x178] sm:$0xff]  ;;  %295 = vmatpush.msra.mxu0 %v33_v0  ;;  %v64_v4 = vld [vmem:[%s1359_s1 + $0x170] sm:$0xff]  ;;  %v63_v8 = vld [vmem:[%s1359_s1 + $0x168] sm:$0xff] }
   0x3   :  { %335 = vmatpush.msra.mxu2 %v65_v1  ;;  %v49_v3 = vld [vmem:[%s1359_s1 + $0xf8] sm:$0xff]  ;;  %v48_v7 = vld [vmem:[%s1359_s1 + $0xf0] sm:$0xff]  ;;  %v47_v10 = vld [vmem:[%s1359_s1 + $0xe8] sm:$0xff] }
   0x4   :  { %v81_v5 = vld [vmem:[%s1359_s1 + $0x1f8] sm:$0xff]  ;;  %315 = vmatpush.msra.mxu1 %v49_v3  ;;  %296 = vmatpush.msra.mxu0 %v32_v2  ;;  %v80_v9 = vld [vmem:[%s1359_s1 + $0x1f0] sm:$0xff]  ;;  %v30_v11 = vld [vmem:[%s1359_s1 + $0x60] sm:$0xff] }
   0x5   :  { %355 = vmatpush.msra.mxu3 %v81_v5  ;;  %336 = vmatpush.msra.mxu2 %v64_v4  ;;  %v62_v12 = vld [vmem:[%s1359_s1 + $0x160] sm:$0xff]  ;;  %v79_v13 = vld [vmem:[%s1359_s1 + $0x1e8] sm:$0xff]  ;;  %v29_v16 = vld [vmem:[%s1359_s1 + $0x58] sm:$0xff] }
   0x6   :  { %316 = vmatpush.msra.mxu1 %v48_v7  ;;  %297 = vmatpush.msra.mxu0 %v31_v6  ;;  %v46_v14 = vld [vmem:[%s1359_s1 + $0xe0] sm:$0xff]  ;;  %v61_v17 = vld [vmem:[%s1359_s1 + $0x158] sm:$0xff]  ;;  %v28_v20 = vld [vmem:[%s1359_s1 + $0x50] sm:$0xff] }
   0x7   :  { %356 = vmatpush.msra.mxu3 %v80_v9  ;;  %337 = vmatpush.msra.mxu2 %v63_v8  ;;  %v78_v15 = vld [vmem:[%s1359_s1 + $0x1e0] sm:$0xff]  ;;  %v45_v18 = vld [vmem:[%s1359_s1 + $0xd8] sm:$0xff]  ;;  %v60_v21 = vld [vmem:[%s1359_s1 + $0x150] sm:$0xff] }
   0x8   :  { %317 = vmatpush.msra.mxu1 %v47_v10  ;;  %298 = vmatpush.msra.mxu0 %v30_v11  ;;  %v77_v19 = vld [vmem:[%s1359_s1 + $0x1d8] sm:$0xff]  ;;  %v44_v22 = vld [vmem:[%s1359_s1 + $0xd0] sm:$0xff]  ;;  %v27_v24 = vld [vmem:[%s1359_s1 + $0x48] sm:$0xff] }
   0x9   :  { %357 = vmatpush.msra.mxu3 %v79_v13  ;;  %338 = vmatpush.msra.mxu2 %v62_v12  ;;  %v76_v23 = vld [vmem:[%s1359_s1 + $0x1d0] sm:$0xff]  ;;  %v59_v25 = vld [vmem:[%s1359_s1 + $0x148] sm:$0xff]  ;;  %v26_v28 = vld [vmem:[%s1359_s1 + $0x40] sm:$0xff] }
   0xa   :  { %318 = vmatpush.msra.mxu1 %v46_v14  ;;  %299 = vmatpush.msra.mxu0 %v29_v16  ;;  %v43_v26 = vld [vmem:[%s1359_s1 + $0xc8] sm:$0xff]  ;;  %v58_v29 = vld [vmem:[%s1359_s1 + $0x140] sm:$0xff]  ;;  %v25_v32 = vld [vmem:[%s1359_s1 + $0x38] sm:$0xff] }
   0xb   :  { %358 = vmatpush.msra.mxu3 %v78_v15  ;;  %339 = vmatpush.msra.mxu2 %v61_v17  ;;  %v75_v27 = vld [vmem:[%s1359_s1 + $0x1c8] sm:$0xff]  ;;  %v42_v30 = vld [vmem:[%s1359_s1 + $0xc0] sm:$0xff]  ;;  %v57_v33 = vld [vmem:[%s1359_s1 + $0x138] sm:$0xff] }
   0xc   :  { %319 = vmatpush.msra.mxu1 %v45_v18  ;;  %300 = vmatpush.msra.mxu0 %v28_v20  ;;  %v74_v31 = vld [vmem:[%s1359_s1 + $0x1c0] sm:$0xff]  ;;  %v41_v34 = vld [vmem:[%s1359_s1 + $0xb8] sm:$0xff]  ;;  %v24_v36 = vld [vmem:[%s1359_s1 + $0x30] sm:$0xff] }
   0xd   :  { %359 = vmatpush.msra.mxu3 %v77_v19  ;;  %340 = vmatpush.msra.mxu2 %v60_v21  ;;  %v73_v35 = vld [vmem:[%s1359_s1 + $0x1b8] sm:$0xff]  ;;  %v56_v37 = vld [vmem:[%s1359_s1 + $0x130] sm:$0xff]  ;;  %v23_v40 = vld [vmem:[%s1359_s1 + $0x28] sm:$0xff] }
   0xe   :  { %320 = vmatpush.msra.mxu1 %v44_v22  ;;  %301 = vmatpush.msra.mxu0 %v27_v24  ;;  %v40_v38 = vld [vmem:[%s1359_s1 + $0xb0] sm:$0xff]  ;;  %v55_v41 = vld [vmem:[%s1359_s1 + $0x128] sm:$0xff]  ;;  %v22_v44 = vld [vmem:[%s1359_s1 + $0x20] sm:$0xff] }
   0xf   :  { %360 = vmatpush.msra.mxu3 %v76_v23  ;;  %341 = vmatpush.msra.mxu2 %v59_v25  ;;  %v72_v39 = vld [vmem:[%s1359_s1 + $0x1b0] sm:$0xff]  ;;  %v39_v42 = vld [vmem:[%s1359_s1 + $0xa8] sm:$0xff]  ;;  %v54_v45 = vld [vmem:[%s1359_s1 + $0x120] sm:$0xff] }
  0x10   :  { %321 = vmatpush.msra.mxu1 %v43_v26  ;;  %302 = vmatpush.msra.mxu0 %v26_v28  ;;  %v71_v43 = vld [vmem:[%s1359_s1 + $0x1a8] sm:$0xff]  ;;  %v38_v46 = vld [vmem:[%s1359_s1 + $0xa0] sm:$0xff]  ;;  %v21_v48 = vld [vmem:[%s1359_s1 + $0x18] sm:$0xff] }
  0x11   :  { %361 = vmatpush.msra.mxu3 %v75_v27  ;;  %342 = vmatpush.msra.mxu2 %v58_v29  ;;  %v70_v47 = vld [vmem:[%s1359_s1 + $0x1a0] sm:$0xff]  ;;  %v53_v49 = vld [vmem:[%s1359_s1 + $0x118] sm:$0xff]  ;;  %v20_v52 = vld [vmem:[%s1359_s1 + $0x10] sm:$0xff] }
  0x12   :  { %322 = vmatpush.msra.mxu1 %v42_v30  ;;  %303 = vmatpush.msra.mxu0 %v25_v32  ;;  %v37_v50 = vld [vmem:[%s1359_s1 + $0x98] sm:$0xff]  ;;  %v52_v53 = vld [vmem:[%s1359_s1 + $0x110] sm:$0xff]  ;;  %v19_v56 = vld [vmem:[%s1359_s1 + $0x8] sm:$0xff] }
  0x13   :  { %362 = vmatpush.msra.mxu3 %v74_v31  ;;  %343 = vmatpush.msra.mxu2 %v57_v33  ;;  %v69_v51 = vld [vmem:[%s1359_s1 + $0x198] sm:$0xff]  ;;  %v36_v54 = vld [vmem:[%s1359_s1 + $0x90] sm:$0xff]  ;;  %v51_v57 = vld [vmem:[%s1359_s1 + $0x108] sm:$0xff] }
  0x14   :  { %323 = vmatpush.msra.mxu1 %v41_v34  ;;  %304 = vmatpush.msra.mxu0 %v24_v36  ;;  %v68_v55 = vld [vmem:[%s1359_s1 + $0x190] sm:$0xff]  ;;  %v35_v58 = vld [vmem:[%s1359_s1 + $0x88] sm:$0xff]  ;;  %v18_v60 = vld [vmem:[%s1359_s1] sm:$0xff] }
  0x15   :  { %363 = vmatpush.msra.mxu3 %v73_v35  ;;  %344 = vmatpush.msra.mxu2 %v56_v37  ;;  %v67_v59 = vld [vmem:[%s1359_s1 + $0x188] sm:$0xff]  ;;  %v50_v61 = vld [vmem:[%s1359_s1 + $0x100] sm:$0xff]  ;;  %v97_v62 = vld [vmem:[%s1359_s1 + $0x278] sm:$0xff] }
  0x16   :  { %324 = vmatpush.msra.mxu1 %v40_v38  ;;  %305 = vmatpush.msra.mxu0 %v23_v40  ;;  %v129_v63 = vld [vmem:[%s1359_s1 + $0x378] sm:$0xff]  ;;  %v34_v0 = vld [vmem:[%s1359_s1 + $0x80] sm:$0xff]  ;;  %v96_v2 = vld [vmem:[%s1359_s1 + $0x270] sm:$0xff] }
  0x17   :  { %364 = vmatpush.msra.mxu3 %v72_v39  ;;  %345 = vmatpush.msra.mxu2 %v55_v41  ;;  %v66_v1 = vld [vmem:[%s1359_s1 + $0x180] sm:$0xff]  ;;  %v113_v3 = vld [vmem:[%s1359_s1 + $0x2f8] sm:$0xff]  ;;  %v128_v4 = vld [vmem:[%s1359_s1 + $0x370] sm:$0xff] }
  0x18   :  { %325 = vmatpush.msra.mxu1 %v39_v42  ;;  %306 = vmatpush.msra.mxu0 %v22_v44  ;;  %v145_v5 = vld [vmem:[%s1359_s1 + $0x3f8] sm:$0xff]  ;;  %v95_v6 = vld [vmem:[%s1359_s1 + $0x268] sm:$0xff]  ;;  %v112_v7 = vld [vmem:[%s1359_s1 + $0x2f0] sm:$0xff] }
  0x19   :  { %365 = vmatpush.msra.mxu3 %v71_v43  ;;  %346 = vmatpush.msra.mxu2 %v54_v45  ;;  %v127_v8 = vld [vmem:[%s1359_s1 + $0x368] sm:$0xff]  ;;  %v144_v9 = vld [vmem:[%s1359_s1 + $0x3f0] sm:$0xff]  ;;  %v94_v10 = vld [vmem:[%s1359_s1 + $0x260] sm:$0xff] }
  0x1a   :  { %326 = vmatpush.msra.mxu1 %v38_v46  ;;  %307 = vmatpush.msra.mxu0 %v21_v48  ;;  %v111_v11 = vld [vmem:[%s1359_s1 + $0x2e8] sm:$0xff]  ;;  %v126_v12 = vld [vmem:[%s1359_s1 + $0x360] sm:$0xff]  ;;  %v93_v14 = vld [vmem:[%s1359_s1 + $0x258] sm:$0xff] }
  0x1b   :  { %366 = vmatpush.msra.mxu3 %v70_v47  ;;  %347 = vmatpush.msra.mxu2 %v53_v49  ;;  %v143_v13 = vld [vmem:[%s1359_s1 + $0x3e8] sm:$0xff]  ;;  %v110_v15 = vld [vmem:[%s1359_s1 + $0x2e0] sm:$0xff]  ;;  %v125_v16 = vld [vmem:[%s1359_s1 + $0x358] sm:$0xff] }
  0x1c   :  { %327 = vmatpush.msra.mxu1 %v37_v50  ;;  %308 = vmatpush.msra.mxu0 %v20_v52  ;;  %v142_v17 = vld [vmem:[%s1359_s1 + $0x3e0] sm:$0xff]  ;;  %v92_v18 = vld [vmem:[%s1359_s1 + $0x250] sm:$0xff]  ;;  %v109_v19 = vld [vmem:[%s1359_s1 + $0x2d8] sm:$0xff] }
  0x1d   :  { %367 = vmatpush.msra.mxu3 %v69_v51  ;;  %348 = vmatpush.msra.mxu2 %v52_v53  ;;  %v124_v20 = vld [vmem:[%s1359_s1 + $0x350] sm:$0xff]  ;;  %v141_v21 = vld [vmem:[%s1359_s1 + $0x3d8] sm:$0xff]  ;;  %v14_v22 = vld [vmem:[%s1360_s0] sm:$0xff] }
  0x1e   :  { %328 = vmatpush.msra.mxu1 %v36_v54  ;;  %309 = vmatpush.msra.mxu0 %v19_v56  ;;  %v91_v23 = vld [vmem:[%s1359_s1 + $0x248] sm:$0xff]  ;;  %v108_v24 = vld [vmem:[%s1359_s1 + $0x2d0] sm:$0xff]  ;;  %258 = vst [vmem:[#allocation1] ss:$4 sm:$0xff] %v14_v22  ;;  %v90_v27 = vld [vmem:[%s1359_s1 + $0x240] sm:$0xff] }
  0x1f   :  { %368 = vmatpush.msra.mxu3 %v68_v55  ;;  %349 = vmatpush.msra.mxu2 %v51_v57  ;;  %v123_v25 = vld [vmem:[%s1359_s1 + $0x348] sm:$0xff]  ;;  %v140_v26 = vld [vmem:[%s1359_s1 + $0x3d0] sm:$0xff]  ;;  %v122_v29 = vld [vmem:[%s1359_s1 + $0x340] sm:$0xff] }
  0x20   :  { %329 = vmatpush.msra.mxu1 %v35_v58  ;;  %310 = vmatpush.msra.mxu0 %v18_v60  ;;  %v107_v28 = vld [vmem:[%s1359_s1 + $0x2c8] sm:$0xff]  ;;  %v89_v31 = vld [vmem:[%s1359_s1 + $0x238] sm:$0xff]  ;;  %v106_v32 = vld [vmem:[%s1359_s1 + $0x2c0] sm:$0xff] }
  0x21   :  { %369 = vmatpush.msra.mxu3 %v67_v59  ;;  %350 = vmatpush.msra.mxu2 %v50_v61  ;;  %v139_v30 = vld [vmem:[%s1359_s1 + $0x3c8] sm:$0xff]  ;;  %v121_v33 = vld [vmem:[%s1359_s1 + $0x338] sm:$0xff]  ;;  %v138_v34 = vld [vmem:[%s1359_s1 + $0x3c0] sm:$0xff] }
  0x22   :  { %375 = vmatpush.msrb.mxu0 %v97_v62  ;;  %330 = vmatpush.msra.mxu1 %v34_v0  ;;  %v88_v35 = vld [vmem:[%s1359_s1 + $0x230] sm:$0xff]  ;;  %v105_v36 = vld [vmem:[%s1359_s1 + $0x2b8] sm:$0xff]  ;;  %v15_v39 = vld [vmem:[%s1360_s0 + $0x8] sm:$0xff] }
  0x23   :  { %415 = vmatpush.msrb.mxu2 %v129_v63  ;;  %370 = vmatpush.msra.mxu3 %v66_v1  ;;  %v120_v37 = vld [vmem:[%s1359_s1 + $0x330] sm:$0xff]  ;;  %v137_v38 = vld [vmem:[%s1359_s1 + $0x3b8] sm:$0xff]  ;;  %v87_v40 = vld [vmem:[%s1359_s1 + $0x228] sm:$0xff]  ;;  %260 = vst [vmem:[#allocation1 + $0x20] ss:$4 sm:$0xff] %v15_v39 }
  0x24   :  { %376 = vmatpush.msrb.mxu0 %v96_v2  ;;  %395 = vmatpush.msrb.mxu1 %v113_v3  ;;  %v104_v41 = vld [vmem:[%s1359_s1 + $0x2b0] sm:$0xff]  ;;  %v119_v43 = vld [vmem:[%s1359_s1 + $0x328] sm:$0xff]  ;;  %v86_v49 = vld [vmem:[%s1359_s1 + $0x220] sm:$0xff] }
  0x25   :  { %416 = vmatpush.msrb.mxu2 %v128_v4  ;;  %435 = vmatpush.msrb.mxu3 %v145_v5  ;;  %v16_v42 = vld [vmem:[%s1360_s0 + $0x10] sm:$0xff]  ;;  %v948_v45 = vld.sshfl [vmem:[#allocation1] sm:$0xff pattern:$0x73625140]  ;;  %v103_v50 = vld [vmem:[%s1359_s1 + $0x2a8] sm:$0xff] }
  0x26   :  { %377 = vmatpush.msrb.mxu0 %v95_v6  ;;  %396 = vmatpush.msrb.mxu1 %v112_v7  ;;  %v263_v44 = vld.sshfl [vmem:[#allocation1 + $0x10] sm:$0xff pattern:$0x73625140]  ;;  %v950_v46 = vld.sshfl [vmem:[#allocation1 + $0x18] sm:$0xff pattern:$0x73625140] }
  0x27   :  { %417 = vmatpush.msrb.mxu2 %v127_v8  ;;  %436 = vmatpush.msrb.mxu3 %v144_v9  ;;  %v952_v47 = vld.sshfl [vmem:[#allocation1 + $0x8] sm:$0xff pattern:$0x73625140]  ;;  %v136_v48 = vld [vmem:[%s1359_s1 + $0x3b0] sm:$0xff]  ;;  %v118_v51 = vld [vmem:[%s1359_s1 + $0x320] sm:$0xff] }
  0x28   :  { %378 = vmatpush.msrb.mxu0 %v94_v10  ;;  %397 = vmatpush.msrb.mxu1 %v111_v11  ;;  %269 = vst [vmem:[#allocation1] ss:$4 sm:$0xff] %v16_v42  ;;  %v135_v52 = vld [vmem:[%s1359_s1 + $0x3a8] sm:$0xff]  ;;  %v85_v53 = vld [vmem:[%s1359_s1 + $0x218] sm:$0xff]  ;;  %v102_v54 = vld [vmem:[%s1359_s1 + $0x2a0] sm:$0xff] }
  0x29   :  { %418 = vmatpush.msrb.mxu2 %v126_v12  ;;  %437 = vmatpush.msrb.mxu3 %v143_v13  ;;  %v117_v55 = vld [vmem:[%s1359_s1 + $0x318] sm:$0xff]  ;;  %v134_v56 = vld [vmem:[%s1359_s1 + $0x3a0] sm:$0xff]  ;;  %v84_v57 = vld [vmem:[%s1359_s1 + $0x210] sm:$0xff] }
  0x2a   :  { %379 = vmatpush.msrb.mxu0 %v93_v14  ;;  %398 = vmatpush.msrb.mxu1 %v110_v15  ;;  %v101_v58 = vld [vmem:[%s1359_s1 + $0x298] sm:$0xff]  ;;  %v990_v60 = vld.sshfl [vmem:[#allocation1 + $0x30] sm:$0xff pattern:$0x73625140]  ;;  %v83_v2 = vld [vmem:[%s1359_s1 + $0x208] sm:$0xff] }
  0x2b   :  { %419 = vmatpush.msrb.mxu2 %v125_v16  ;;  %438 = vmatpush.msrb.mxu3 %v142_v17  ;;  %v17_v59 = vld [vmem:[%s1360_s0 + $0x18] sm:$0x3f]  ;;  %v992_v61 = vld.sshfl [vmem:[#allocation1 + $0x20] sm:$0xff pattern:$0x73625140]  ;;  %v116_v0 = vld [vmem:[%s1359_s1 + $0x310] sm:$0xff] }
  0x2c   :  { %380 = vmatpush.msrb.mxu0 %v92_v18  ;;  %399 = vmatpush.msrb.mxu1 %v109_v19  ;;  %v994_v62 = vld.sshfl [vmem:[#allocation1 + $0x38] sm:$0xff pattern:$0x73625140]  ;;  %v996_v63 = vld.sshfl [vmem:[#allocation1 + $0x28] sm:$0xff pattern:$0x73625140] }
  0x2d   :  { %420 = vmatpush.msrb.mxu2 %v124_v20  ;;  %439 = vmatpush.msrb.mxu3 %v141_v21  ;;  %v133_v1 = vld [vmem:[%s1359_s1 + $0x398] sm:$0xff]  ;;  %270 = vst [vmem:[#allocation1 + $0x20] ss:$4 sm:$0xff] %v17_v59  ;;  %v100_v3 = vld [vmem:[%s1359_s1 + $0x290] sm:$0xff]  ;;  %v115_v4 = vld [vmem:[%s1359_s1 + $0x308] sm:$0xff] }
  0x2e   :  { %381 = vmatpush.msrb.mxu0 %v91_v23  ;;  %400 = vmatpush.msrb.mxu1 %v108_v24  ;;  %v132_v5 = vld [vmem:[%s1359_s1 + $0x390] sm:$0xff]  ;;  %v82_v6 = vld [vmem:[%s1359_s1 + $0x200] sm:$0xff]  ;;  %v99_v7 = vld [vmem:[%s1359_s1 + $0x288] sm:$0xff] }
  0x2f   :  { %421 = vmatpush.msrb.mxu2 %v123_v25  ;;  %440 = vmatpush.msrb.mxu3 %v140_v26  ;;  %v114_v8 = vld [vmem:[%s1359_s1 + $0x300] sm:$0xff]  ;;  %v131_v9 = vld [vmem:[%s1359_s1 + $0x388] sm:$0xff]  ;;  %v161_v10 = vld [vmem:[%s1359_s1 + $0x478] sm:$0xff] }
  0x30   :  { %382 = vmatpush.msrb.mxu0 %v90_v27  ;;  %401 = vmatpush.msrb.mxu1 %v107_v28  ;;  %v193_v11 = vld [vmem:[%s1359_s1 + $0x578] sm:$0xff]  ;;  %v98_v12 = vld [vmem:[%s1359_s1 + $0x280] sm:$0xff]  ;;  %v160_v14 = vld [vmem:[%s1359_s1 + $0x470] sm:$0xff] }
  0x31   :  { %422 = vmatpush.msrb.mxu2 %v122_v29  ;;  %441 = vmatpush.msrb.mxu3 %v139_v30  ;;  %v130_v13 = vld [vmem:[%s1359_s1 + $0x380] sm:$0xff]  ;;  %v177_v15 = vld [vmem:[%s1359_s1 + $0x4f8] sm:$0xff]  ;;  %v192_v16 = vld [vmem:[%s1359_s1 + $0x570] sm:$0xff] }
  0x32   :  { %383 = vmatpush.msrb.mxu0 %v89_v31  ;;  %402 = vmatpush.msrb.mxu1 %v106_v32  ;;  %v209_v17 = vld [vmem:[%s1359_s1 + $0x5f8] sm:$0xff]  ;;  %v159_v18 = vld [vmem:[%s1359_s1 + $0x468] sm:$0xff]  ;;  %v176_v19 = vld [vmem:[%s1359_s1 + $0x4f0] sm:$0xff] }
  0x33   :  { %423 = vmatpush.msrb.mxu2 %v121_v33  ;;  %442 = vmatpush.msrb.mxu3 %v138_v34  ;;  %v191_v20 = vld [vmem:[%s1359_s1 + $0x568] sm:$0xff]  ;;  %v208_v21 = vld [vmem:[%s1359_s1 + $0x5f0] sm:$0xff]  ;;  %v158_v22 = vld [vmem:[%s1359_s1 + $0x460] sm:$0xff] }
  0x34   :  { %384 = vmatpush.msrb.mxu0 %v88_v35  ;;  %403 = vmatpush.msrb.mxu1 %v105_v36  ;;  %v175_v23 = vld [vmem:[%s1359_s1 + $0x4e8] sm:$0xff]  ;;  %v190_v24 = vld [vmem:[%s1359_s1 + $0x560] sm:$0xff]  ;;  %v157_v26 = vld [vmem:[%s1359_s1 + $0x458] sm:$0xff] }
  0x35   :  { %424 = vmatpush.msrb.mxu2 %v120_v37  ;;  %443 = vmatpush.msrb.mxu3 %v137_v38  ;;  %v207_v25 = vld [vmem:[%s1359_s1 + $0x5e8] sm:$0xff]  ;;  %v174_v27 = vld [vmem:[%s1359_s1 + $0x4e0] sm:$0xff]  ;;  %v189_v28 = vld [vmem:[%s1359_s1 + $0x558] sm:$0xff] }
  0x36   :  { %385 = vmatpush.msrb.mxu0 %v87_v40  ;;  %404 = vmatpush.msrb.mxu1 %v104_v41  ;;  %v206_v29 = vld [vmem:[%s1359_s1 + $0x5e0] sm:$0xff]  ;;  %v156_v30 = vld [vmem:[%s1359_s1 + $0x450] sm:$0xff]  ;;  %v173_v31 = vld [vmem:[%s1359_s1 + $0x4d8] sm:$0xff] }
  0x37   :  { %425 = vmatpush.msrb.mxu2 %v119_v43  ;;  %444 = vmatpush.msrb.mxu3 %v136_v48  ;;  %v188_v32 = vld [vmem:[%s1359_s1 + $0x550] sm:$0xff]  ;;  %v205_v33 = vld [vmem:[%s1359_s1 + $0x5d8] sm:$0xff]  ;;  %v155_v34 = vld [vmem:[%s1359_s1 + $0x448] sm:$0xff] }
  0x38   :  { %386 = vmatpush.msrb.mxu0 %v86_v49  ;;  %405 = vmatpush.msrb.mxu1 %v103_v50  ;;  %v172_v35 = vld [vmem:[%s1359_s1 + $0x4d0] sm:$0xff]  ;;  %v187_v36 = vld [vmem:[%s1359_s1 + $0x548] sm:$0xff]  ;;  %v154_v38 = vld [vmem:[%s1359_s1 + $0x440] sm:$0xff] }
  0x39   :  { %426 = vmatpush.msrb.mxu2 %v118_v51  ;;  %445 = vmatpush.msrb.mxu3 %v135_v52  ;;  %v204_v37 = vld [vmem:[%s1359_s1 + $0x5d0] sm:$0xff]  ;;  %v171_v39 = vld [vmem:[%s1359_s1 + $0x4c8] sm:$0xff]  ;;  %v186_v40 = vld [vmem:[%s1359_s1 + $0x540] sm:$0xff] }
  0x3a   :  { %387 = vmatpush.msrb.mxu0 %v85_v53  ;;  %406 = vmatpush.msrb.mxu1 %v102_v54  ;;  %v203_v41 = vld [vmem:[%s1359_s1 + $0x5c8] sm:$0xff]  ;;  %v153_v42 = vld [vmem:[%s1359_s1 + $0x438] sm:$0xff]  ;;  %v170_v43 = vld [vmem:[%s1359_s1 + $0x4c0] sm:$0xff] }
  0x3b   :  { %427 = vmatpush.msrb.mxu2 %v117_v55  ;;  %446 = vmatpush.msrb.mxu3 %v134_v56  ;;  %v184_v48 = vld [vmem:[%s1359_s1 + $0x530] sm:$0xff]  ;;  %v201_v49 = vld [vmem:[%s1359_s1 + $0x5b8] sm:$0xff]  ;;  %v151_v50 = vld [vmem:[%s1359_s1 + $0x428] sm:$0xff] }
  0x3c   :  { %388 = vmatpush.msrb.mxu0 %v84_v57  ;;  %407 = vmatpush.msrb.mxu1 %v101_v58  ;;  %v168_v51 = vld [vmem:[%s1359_s1 + $0x4b0] sm:$0xff]  ;;  %v183_v52 = vld [vmem:[%s1359_s1 + $0x528] sm:$0xff]  ;;  %v150_v54 = vld [vmem:[%s1359_s1 + $0x420] sm:$0xff] }
  0x3d   :  { %428 = vmatpush.msrb.mxu2 %v116_v0  ;;  %447 = vmatpush.msrb.mxu3 %v133_v1  ;;  %v200_v53 = vld [vmem:[%s1359_s1 + $0x5b0] sm:$0xff]  ;;  %v167_v55 = vld [vmem:[%s1359_s1 + $0x4a8] sm:$0xff]  ;;  %v182_v56 = vld [vmem:[%s1359_s1 + $0x520] sm:$0xff] }
  0x3e   :  { %389 = vmatpush.msrb.mxu0 %v83_v2  ;;  %408 = vmatpush.msrb.mxu1 %v100_v3  ;;  %v199_v57 = vld [vmem:[%s1359_s1 + $0x5a8] sm:$0xff]  ;;  %v149_v58 = vld [vmem:[%s1359_s1 + $0x418] sm:$0xff]  ;;  %v166_v59 = vld [vmem:[%s1359_s1 + $0x4a0] sm:$0xff] }
  0x3f   :  { %429 = vmatpush.msrb.mxu2 %v115_v4  ;;  %448 = vmatpush.msrb.mxu3 %v132_v5  ;;  %v180_v0 = vld [vmem:[%s1359_s1 + $0x510] sm:$0xff]  ;;  %v197_v1 = vld [vmem:[%s1359_s1 + $0x598] sm:$0xff]  ;;  %v147_v2 = vld [vmem:[%s1359_s1 + $0x408] sm:$0xff] }
  0x40   :  { %351 = vmatmul.f32.vlgmr.msra.gmra.mxu2 %v263_v44  ;;  %390 = vmatpush.msrb.mxu0 %v82_v6  ;;  %v185_v44 = vld [vmem:[%s1359_s1 + $0x538] sm:$0xff]  ;;  %v164_v3 = vld [vmem:[%s1359_s1 + $0x490] sm:$0xff]  ;;  %v179_v4 = vld [vmem:[%s1359_s1 + $0x508] sm:$0xff] }
  0x41   :  { %409 = vmatpush.msrb.mxu1 %v99_v7  ;;  %430 = vmatpush.msrb.mxu2 %v114_v8  ;;  %v196_v5 = vld [vmem:[%s1359_s1 + $0x590] sm:$0xff]  ;;  %v146_v6 = vld [vmem:[%s1359_s1 + $0x400] sm:$0xff]  ;;  %v163_v7 = vld [vmem:[%s1359_s1 + $0x488] sm:$0xff] }
  0x42   :  { %449 = vmatpush.msrb.mxu3 %v131_v9  ;;  %311 = vmatmul.f32.vlgmr.msra.gmra.mxu0 %v948_v45  ;;  %v202_v45 = vld [vmem:[%s1359_s1 + $0x5c0] sm:$0xff]  ;;  %v195_v9 = vld [vmem:[%s1359_s1 + $0x588] sm:$0xff] }
  0x43   :  { %371 = vmatmul.f32.vlgmr.msra.gmra.mxu3 %v950_v46  ;;  %455 = vmatpush.msra.mxu0 %v161_v10  ;;  %v152_v46 = vld [vmem:[%s1359_s1 + $0x430] sm:$0xff]  ;;  %v178_v8 = vld [vmem:[%s1359_s1 + $0x500] sm:$0xff] }
  0x44   :  { %495 = vmatpush.msra.mxu2 %v193_v11  ;;  %410 = vmatpush.msrb.mxu1 %v98_v12  ;;  %v271_v10 = vld.sshfl [vmem:[#allocation1] sm:$0xff pattern:$0x73625140]  ;;  %v273_v11 = vld.sshfl [vmem:[#allocation1 + $0x10] sm:$0xff pattern:$0x73625140] }
  0x45   :  { %450 = vmatpush.msrb.mxu3 %v130_v13  ;;  %331 = vmatmul.f32.vlgmr.msra.gmra.mxu1 %v952_v47  ;;  %v169_v47 = vld [vmem:[%s1359_s1 + $0x4b8] sm:$0xff]  ;;  %v162_v13 = vld [vmem:[%s1359_s1 + $0x480] sm:$0xff] }
  0x46   :  { %456 = vmatpush.msra.mxu0 %v160_v14  ;;  %475 = vmatpush.msra.mxu1 %v177_v15  ;;  %v225_v12 = vld [vmem:[%s1359_s1 + $0x678] sm:$0xff]  ;;  %v194_v14 = vld [vmem:[%s1359_s1 + $0x580] sm:$0xff]  ;;  %v272_v15 = vld.sshfl [vmem:[#allocation1 + $0x8] sm:$0xff pattern:$0x73625140] }
  0x47   :  { %496 = vmatpush.msra.mxu2 %v192_v16  ;;  %515 = vmatpush.msra.mxu3 %v209_v17  ;;  %v274_v16 = vld.sshfl [vmem:[#allocation1 + $0x18] sm:$0xff pattern:$0x73625140]  ;;  %v224_v17 = vld [vmem:[%s1359_s1 + $0x670] sm:$0xff] }
  0x48   :  { %457 = vmatpush.msra.mxu0 %v159_v18  ;;  %476 = vmatpush.msra.mxu1 %v176_v19  ;;  %v241_v18 = vld [vmem:[%s1359_s1 + $0x6f8] sm:$0xff] }
  0x49   :  { %497 = vmatpush.msra.mxu2 %v191_v20  ;;  %516 = vmatpush.msra.mxu3 %v208_v21  ;;  %v249_v19 = vld [vmem:[%s1359_s1 + $0x738] sm:$0xff]  ;;  %v223_v20 = vld [vmem:[%s1359_s1 + $0x668] sm:$0xff]  ;;  %v240_v21 = vld [vmem:[%s1359_s1 + $0x6f0] sm:$0xff] }
  0x4a   :  { %431 = vmatmul.f32.vlgmr.msrb.gmra.mxu2 %v990_v60  ;;  %458 = vmatpush.msra.mxu0 %v158_v22  ;;  %v181_v60 = vld [vmem:[%s1359_s1 + $0x518] sm:$0xff]  ;;  %v248_v22 = vld [vmem:[%s1359_s1 + $0x730] sm:$0xff] }
  0x4b   :  { %477 = vmatpush.msra.mxu1 %v175_v23  ;;  %498 = vmatpush.msra.mxu2 %v190_v24  ;;  %v222_v23 = vld [vmem:[%s1359_s1 + $0x660] sm:$0xff]  ;;  %v239_v24 = vld [vmem:[%s1359_s1 + $0x6e8] sm:$0xff] }
  0x4c   :  { %517 = vmatpush.msra.mxu3 %v207_v25  ;;  %391 = vmatmul.f32.vlgmr.msrb.gmra.mxu0 %v992_v61  ;;  %v198_v61 = vld [vmem:[%s1359_s1 + $0x5a0] sm:$0xff]  ;;  %v247_v25 = vld [vmem:[%s1359_s1 + $0x728] sm:$0xff] }
  0x4d   :  { %451 = vmatmul.f32.vlgmr.msrb.gmra.mxu3 %v994_v62  ;;  %459 = vmatpush.msra.mxu0 %v157_v26  ;;  %v148_v62 = vld [vmem:[%s1359_s1 + $0x410] sm:$0xff]  ;;  %v221_v26 = vld [vmem:[%s1359_s1 + $0x658] sm:$0xff] }
  0x4e   :  { %478 = vmatpush.msra.mxu1 %v174_v27  ;;  %499 = vmatpush.msra.mxu2 %v189_v28  ;;  %v238_v27 = vld [vmem:[%s1359_s1 + $0x6e0] sm:$0xff] }
  0x4f   :  { %518 = vmatpush.msra.mxu3 %v206_v29  ;;  %411 = vmatmul.f32.vlgmr.msrb.gmra.mxu1 %v996_v63  ;;  %v165_v63 = vld [vmem:[%s1359_s1 + $0x498] sm:$0xff]  ;;  %v246_v28 = vld [vmem:[%s1359_s1 + $0x720] sm:$0xff]  ;;  %v220_v29 = vld [vmem:[%s1359_s1 + $0x650] sm:$0xff] }
  0x50   :  { %460 = vmatpush.msra.mxu0 %v156_v30  ;;  %479 = vmatpush.msra.mxu1 %v173_v31  ;;  %v237_v30 = vld [vmem:[%s1359_s1 + $0x6d8] sm:$0xff] }
  0x51   :  { %500 = vmatpush.msra.mxu2 %v188_v32  ;;  %519 = vmatpush.msra.mxu3 %v205_v33  ;;  %v245_v31 = vld [vmem:[%s1359_s1 + $0x718] sm:$0xff]  ;;  %v219_v32 = vld [vmem:[%s1359_s1 + $0x648] sm:$0xff]  ;;  %v236_v33 = vld [vmem:[%s1359_s1 + $0x6d0] sm:$0xff] }
  0x52   :  { %461 = vmatpush.msra.mxu0 %v155_v34  ;;  %480 = vmatpush.msra.mxu1 %v172_v35  ;;  %v244_v34 = vld [vmem:[%s1359_s1 + $0x710] sm:$0xff]  ;;  %v218_v35 = vld [vmem:[%s1359_s1 + $0x640] sm:$0xff] }
  0x53   :  { %501 = vmatpush.msra.mxu2 %v187_v36  ;;  %520 = vmatpush.msra.mxu3 %v204_v37  ;;  %v235_v36 = vld [vmem:[%s1359_s1 + $0x6c8] sm:$0xff] }
  0x54   :  { %462 = vmatpush.msra.mxu0 %v154_v38  ;;  %481 = vmatpush.msra.mxu1 %v171_v39  ;;  %v243_v37 = vld [vmem:[%s1359_s1 + $0x708] sm:$0xff]  ;;  %v217_v38 = vld [vmem:[%s1359_s1 + $0x638] sm:$0xff]  ;;  %v234_v39 = vld [vmem:[%s1359_s1 + $0x6c0] sm:$0xff] }
  0x55   :  { %502 = vmatpush.msra.mxu2 %v186_v40  ;;  %521 = vmatpush.msra.mxu3 %v203_v41  ;;  %v242_v40 = vld [vmem:[%s1359_s1 + $0x700] sm:$0xff]  ;;  %v216_v41 = vld [vmem:[%s1359_s1 + $0x630] sm:$0xff] }
  0x56   :  { %463 = vmatpush.msra.mxu0 %v153_v42  ;;  %482 = vmatpush.msra.mxu1 %v170_v43  ;;  %v277_v42 = vld.sshfl [vmem:[#allocation1 + $0x30] sm:$0xff pattern:$0x73625140]  ;;  %v233_v43 = vld [vmem:[%s1359_s1 + $0x6b8] sm:$0xff] }
  0x57   :  { %503 = vmatpush.msra.mxu2 %v185_v44  ;;  %522 = vmatpush.msra.mxu3 %v202_v45  ;;  %v215_v44 = vld [vmem:[%s1359_s1 + $0x628] sm:$0xff]  ;;  %v232_v45 = vld [vmem:[%s1359_s1 + $0x6b0] sm:$0xff] }
  0x58   :  { %464 = vmatpush.msra.mxu0 %v152_v46  ;;  %483 = vmatpush.msra.mxu1 %v169_v47  ;;  %v214_v46 = vld [vmem:[%s1359_s1 + $0x620] sm:$0xff]  ;;  %v231_v47 = vld [vmem:[%s1359_s1 + $0x6a8] sm:$0xff] }
  0x59   :  { %504 = vmatpush.msra.mxu2 %v184_v48  ;;  %523 = vmatpush.msra.mxu3 %v201_v49  ;;  %v213_v48 = vld [vmem:[%s1359_s1 + $0x618] sm:$0xff]  ;;  %v230_v49 = vld [vmem:[%s1359_s1 + $0x6a0] sm:$0xff] }
  0x5a   :  { %465 = vmatpush.msra.mxu0 %v151_v50  ;;  %484 = vmatpush.msra.mxu1 %v168_v51  ;;  %v212_v50 = vld [vmem:[%s1359_s1 + $0x610] sm:$0xff]  ;;  %v229_v51 = vld [vmem:[%s1359_s1 + $0x698] sm:$0xff] }
  0x5b   :  { %505 = vmatpush.msra.mxu2 %v183_v52  ;;  %524 = vmatpush.msra.mxu3 %v200_v53  ;;  %v211_v52 = vld [vmem:[%s1359_s1 + $0x608] sm:$0xff]  ;;  %v228_v53 = vld [vmem:[%s1359_s1 + $0x690] sm:$0xff] }
  0x5c   :  { %466 = vmatpush.msra.mxu0 %v150_v54  ;;  %485 = vmatpush.msra.mxu1 %v167_v55  ;;  %v210_v54 = vld [vmem:[%s1359_s1 + $0x600] sm:$0xff]  ;;  %v227_v55 = vld [vmem:[%s1359_s1 + $0x688] sm:$0xff] }
  0x5d   :  { %506 = vmatpush.msra.mxu2 %v182_v56  ;;  %525 = vmatpush.msra.mxu3 %v199_v57  ;;  %v275_v56 = vld.sshfl [vmem:[#allocation1 + $0x20] sm:$0xff pattern:$0x73625140] }
  0x5e   :  { %467 = vmatpush.msra.mxu0 %v149_v58  ;;  %486 = vmatpush.msra.mxu1 %v166_v59  ;;  %v226_v57 = vld [vmem:[%s1359_s1 + $0x680] sm:$0xff]  ;;  %v276_v58 = vld.sshfl [vmem:[#allocation1 + $0x28] sm:$0xff pattern:$0x73625140] }
  0x5f   :  { %507 = vmatpush.msra.mxu2 %v181_v60  ;;  %526 = vmatpush.msra.mxu3 %v198_v61  ;;  %v603_v59 = vld [vmem:[%s1361_s2] ss:$0 sm:$0xff] }
  0x60   :  { %468 = vmatpush.msra.mxu0 %v148_v62  ;;  %487 = vmatpush.msra.mxu1 %v165_v63 }
  0x61   :  { %508 = vmatpush.msra.mxu2 %v180_v0  ;;  %527 = vmatpush.msra.mxu3 %v197_v1 }
  0x62   :  { %469 = vmatpush.msra.mxu0 %v147_v2  ;;  %488 = vmatpush.msra.mxu1 %v164_v3 }
  0x63   :  { %509 = vmatpush.msra.mxu2 %v179_v4  ;;  %528 = vmatpush.msra.mxu3 %v196_v5 }
  0x64   :  { %470 = vmatpush.msra.mxu0 %v146_v6  ;;  %489 = vmatpush.msra.mxu1 %v163_v7 }
  0x65   :  { %510 = vmatpush.msra.mxu2 %v178_v8  ;;  %529 = vmatpush.msra.mxu3 %v195_v9 }
  0x66   :  { %471 = vmatmul.f32.vlgmr.msra.gmra.mxu0 %v271_v10  ;;  %511 = vmatmul.f32.vlgmr.msra.gmra.mxu2 %v273_v11 }
  0x67   :  { %535 = vmatpush.msrb.mxu0 %v225_v12  ;;  %490 = vmatpush.msra.mxu1 %v162_v13 }
  0x68   :  { %530 = vmatpush.msra.mxu3 %v194_v14  ;;  %491 = vmatmul.f32.vlgmr.msra.gmra.mxu1 %v272_v15 }
  0x69   :  { %531 = vmatmul.f32.vlgmr.msra.gmra.mxu3 %v274_v16  ;;  %536 = vmatpush.msrb.mxu0 %v224_v17 }
  0x6a   :  { %555 = vmatpush.msrb.mxu1 %v241_v18  ;;  %583 = vmatpush.msrb.mxu2 %v249_v19 }
  0x6b   :  { %537 = vmatpush.msrb.mxu0 %v223_v20 }
  0x6c   :  { %556 = vmatpush.msrb.mxu1 %v240_v21  ;;  %584 = vmatpush.msrb.mxu2 %v248_v22 }
  0x6d   :  { %538 = vmatpush.msrb.mxu0 %v222_v23 }
  0x6e   :  { %557 = vmatpush.msrb.mxu1 %v239_v24  ;;  %585 = vmatpush.msrb.mxu2 %v247_v25 }
  0x6f   :  { %539 = vmatpush.msrb.mxu0 %v221_v26 }
  0x70   :  { %558 = vmatpush.msrb.mxu1 %v238_v27  ;;  %586 = vmatpush.msrb.mxu2 %v246_v28 }
  0x71   :  { %540 = vmatpush.msrb.mxu0 %v220_v29 }
  0x72   :  { %559 = vmatpush.msrb.mxu1 %v237_v30  ;;  %587 = vmatpush.msrb.mxu2 %v245_v31 }
  0x73   :  { %541 = vmatpush.msrb.mxu0 %v219_v32 }
  0x74   :  { %560 = vmatpush.msrb.mxu1 %v236_v33  ;;  %588 = vmatpush.msrb.mxu2 %v244_v34 }
  0x75   :  { %542 = vmatpush.msrb.mxu0 %v218_v35 }
  0x76   :  { %561 = vmatpush.msrb.mxu1 %v235_v36  ;;  %589 = vmatpush.msrb.mxu2 %v243_v37 }
  0x77   :  { %543 = vmatpush.msrb.mxu0 %v217_v38 }
  0x78   :  { %562 = vmatpush.msrb.mxu1 %v234_v39  ;;  %590 = vmatpush.msrb.mxu2 %v242_v40 }
  0x79   :  { %544 = vmatpush.msrb.mxu0 %v216_v41  ;;  %602 = vmatmul.msk.f32.vlgmr.msrb.gmra.mxu2 %vm292_vm0, %v277_v42 }
  0x7a   :  { %563 = vmatpush.msrb.mxu1 %v233_v43 }
  0x7b   :  { %545 = vmatpush.msrb.mxu0 %v215_v44 }
  0x7c   :  { %564 = vmatpush.msrb.mxu1 %v232_v45 }
  0x7d   :  { %546 = vmatpush.msrb.mxu0 %v214_v46 }
  0x7e   :  { %565 = vmatpush.msrb.mxu1 %v231_v47 }
  0x7f   :  { %547 = vmatpush.msrb.mxu0 %v213_v48 }
  0x80   :  { %566 = vmatpush.msrb.mxu1 %v230_v49 }
  0x81   :  { %548 = vmatpush.msrb.mxu0 %v212_v50 }
  0x82   :  { %567 = vmatpush.msrb.mxu1 %v229_v51 }
  0x83   :  { %549 = vmatpush.msrb.mxu0 %v211_v52 }
  0x84   :  { %568 = vmatpush.msrb.mxu1 %v228_v53 }
  0x85   :  { %550 = vmatpush.msrb.mxu0 %v210_v54 }
  0x86   :  { %569 = vmatpush.msrb.mxu1 %v227_v55  ;;  %551 = vmatmul.f32.vlgmr.msrb.gmra.mxu0 %v275_v56 }
  0x88   :  { %570 = vmatpush.msrb.mxu1 %v226_v57 }
  0x89   :  { %571 = vmatmul.f32.vlgmr.msrb.gmra.mxu1 %v276_v58 }
  0xbf   :  { %v312_v60 = vpop.f32.mrf.mxu0 }
  0xc0   :  { %v313_v61 = vadd.f32 %v603_v59, %v312_v60 }
  0xc2   :  { %v332_v62 = vpop.f32.mrf.mxu1 }
  0xc3   :  { %v333_v63 = vadd.f32 %v332_v62, %v313_v61  ;;  %v352_v0 = vpop.f32.mrf.mxu2 }
  0xc5   :  { %v353_v1 = vadd.f32 %v352_v0, %v333_v63 }
  0xc6   :  { %v372_v2 = vpop.f32.mrf.mxu3 }
  0xc7   :  { %v373_v3 = vadd.f32 %v372_v2, %v353_v1 }
  0xc9   :  { %v392_v4 = vpop.f32.mrf.mxu0 }
  0xca   :  { %v393_v5 = vadd.f32 %v392_v4, %v373_v3 }
  0xcc   :  { %v412_v6 = vpop.f32.mrf.mxu1 }
  0xcd   :  { %v413_v7 = vadd.f32 %v412_v6, %v393_v5  ;;  %v432_v8 = vpop.f32.mrf.mxu2 }
  0xcf   :  { %v433_v9 = vadd.f32 %v432_v8, %v413_v7 }
  0xd0   :  { %v452_v10 = vpop.f32.mrf.mxu3 }
  0xd1   :  { %v453_v12 = vadd.f32 %v452_v10, %v433_v9 }
  0xe3   :  { %v472_v11 = vpop.f32.mrf.mxu0 }
  0xe4   :  { %v473_v13 = vadd.f32 %v472_v11, %v453_v12 }
  0xe5   :  { %v492_v14 = vpop.f32.mrf.mxu1 }
  0xe6   :  { %v493_v16 = vadd.f32 %v492_v14, %v473_v13 }
  0xe9   :  { %v512_v15 = vpop.f32.mrf.mxu2 }
  0xea   :  { %v513_v17 = vadd.f32 %v512_v15, %v493_v16 }
  0xec   :  { %v532_v18 = vpop.f32.mrf.mxu3 }
  0xed   :  { %v533_v19 = vadd.f32 %v532_v18, %v513_v17 }
  0xfc   :  { %v592_v23 = vpop.f32.mrf.mxu2 }
 0x103   :  { %v552_v20 = vpop.f32.mrf.mxu0 }
 0x104   :  { %v553_v21 = vadd.f32 %v552_v20, %v533_v19 }
 0x106   :  { %v572_v22 = vpop.f32.mrf.mxu1 }
 0x107   :  { %v573_v24 = vadd.f32 %v572_v22, %v553_v21 }
 0x109   :  { %v593_v25 = vadd.f32 %v592_v23, %v573_v24 }
 0x10b   :  { %v595_v26 = vmax.f32 %v593_v25, 0.0 }
 0x10d   :  { %597 = vst.msk [vmem:[%s1362_s3] sm:$0x3] %vm596_vm1, %v595_v26 }

</bundles_post_ra>
